<compile_context>
chip_gen: v6e
topology: v6e:2x2x1
jax: 0.10.0
libtpu: 0.0.40
codegen_flags: <defaults>
</compile_context>

<pallas_src>
import functools

import jax
import jax.numpy as jnp
from jax.experimental import pallas as pl
from jax.experimental.pallas import tpu as pltpu


def _sigmoid(x):
    # sigmoid(x) == 0.5 * (tanh(x/2) + 1): a single EUP transcendental per call
    # (vs exp + reciprocal), identical numerics up to rounding.  [review #7]
    return 0.5 * jnp.tanh(0.5 * x) + 0.5


# ----------------------------- fused LSTM + gather + FC kernel -----------------------------
def _audio_lstm_kernel(x_ref, seq_ref, h0_ref, c0_ref, wih_ref, whh_ref, b_ref,
                       fcw_ref, fcb_ref,
                       out_ref, hn_ref, cn_ref,
                       xproj_ref, h_scr, c_scr, lh_scr,
                       *, seq_length, chunk, batch_pad, hidden):
    T, Tc, Bp, H = seq_length, chunk, batch_pad, hidden
    k = pl.program_id(0)                 # time-chunk index ("arbitrary" grid axis)
    n_chunks = pl.num_programs(0)

    # Initialize the cross-chunk carries once.
    @pl.when(k == 0)
    def _init():
        h_scr[...] = h0_ref[...]
        c_scr[...] = c0_ref[...]
        lh_scr[...] = jnp.zeros_like(lh_scr)

    # Hoisted input projection for THIS chunk only: one (Tc*Bp, F)x(F, 4H) bf16 MXU matmul
    # with f32 accumulation, + combined bias.  Bounded VMEM regardless of T.  [review #2,#3]
    xproj_ref[...] = (
        jnp.dot(x_ref[...], wih_ref[...], preferred_element_type=jnp.float32)
        + b_ref[...])

    # Per-row index of the last valid timestep, clamped into [0, T-1] for robustness.
    # (seq_len <= 0 or > T is clamped here; PyTorch would wrap/error — see wrapper note.)
    last_t = jnp.clip(seq_ref[...] - 1, 0, T - 1)            # (Bp, 1) int32

    def step(tt, carry):
        h, c, last_h = carry
        t = k * Tc + tt                                       # global timestep
        # Tile-aligned dynamic read of this timestep's precomputed input projection.
        start = pl.multiple_of(tt * Bp, Bp)                   # Bp is a multiple of 8  [review #5]
        gates = (xproj_ref[pl.ds(start, Bp), :]
                 + jnp.dot(h.astype(jnp.bfloat16), whh_ref[...],   # W_hh read in-loop  [review #1,#2]
                           preferred_element_type=jnp.float32))    # (Bp, 4H) f32
        # PyTorch gate order: i, f, g, o — 128-lane-aligned slices when H == 128.
        i_g = _sigmoid(gates[:, 0 * H:1 * H])
        f_g = _sigmoid(gates[:, 1 * H:2 * H])
        g_g = jnp.tanh(gates[:, 2 * H:3 * H])
        o_g = _sigmoid(gates[:, 3 * H:4 * H])
        c_new = f_g * c + i_g * g_g                           # cell state stays f32
        h_new = o_g * jnp.tanh(c_new)
        if T % Tc != 0:
            # Only the (static) ragged-last-chunk case needs masking of padded timesteps.
            valid = t < T
            h_new = jnp.where(valid, h_new, h)
            c_new = jnp.where(valid, c_new, c)
        last_h = jnp.where(last_t == t, h_new, last_h)        # fused seq_len gather
        return h_new, c_new, last_h

    h_f, c_f, lh_f = jax.lax.fori_loop(
        0, Tc, step, (h_scr[...], c_scr[...], lh_scr[...]),
        unroll=min(Tc, 8))                                    # bounded unroll  [review #6]

    h_scr[...] = h_f
    c_scr[...] = c_f
    lh_scr[...] = lh_f

    @pl.when(k == n_chunks - 1)
    def _finalize():
        hn_ref[...] = h_f                                     # final states written once
        cn_ref[...] = c_f
        # TODO(synk): nn.Dropout is identity at inference; training-mode dropout not applied.
        # Fused FC on the gathered last-valid hidden state (tiny matmul, kept f32).
        out_ref[...] = (jnp.dot(lh_f, fcw_ref[...], preferred_element_type=jnp.float32)
                        + fcb_ref[...])


def audio_lstm_forward(x2d, seq2d, h0, c0, wih_t, whh_t, bias, fcw_t, fcb,
                       *, seq_length, chunk, batch_pad, hidden, out_feature):
    """x2d: (T_pad*Bp, F) time-major bf16, batch padded to Bp, time padded to a multiple of
    `chunk`.  Returns (out (Bp, OUT), h_n (Bp, H), c_n (Bp, H))."""
    T, Tc, Bp, H = seq_length, chunk, batch_pad, hidden
    F_in = x2d.shape[1]
    n_chunks = x2d.shape[0] // (Tc * Bp)

    kernel = functools.partial(_audio_lstm_kernel,
                               seq_length=T, chunk=Tc, batch_pad=Bp, hidden=H)

    # Explicit VMEM budget: chunked xproj + double-buffered x chunk + weights + carries,
    # with headroom.  [review #9]
    xproj_bytes = Tc * Bp * 4 * H * 4
    xchunk_bytes = Tc * Bp * F_in * x2d.dtype.itemsize
    weight_bytes = (F_in * 4 * H + H * 4 * H) * 2 + (H * out_feature + 4 * H + out_feature) * 4
    state_bytes = 5 * Bp * H * 4 + Bp * out_feature * 4 + Bp * 4
    vmem_limit = int(min(64 * 1024 * 1024,
                         max(16 * 1024 * 1024,
                             xproj_bytes + 2 * xchunk_bytes + 2 * weight_bytes
                             + 2 * state_bytes + (4 << 20))))

    grid_spec = pltpu.PrefetchScalarGridSpec(
        num_scalar_prefetch=0,
        grid=(n_chunks,),
        in_specs=[
            # x is streamed one time-chunk at a time (auto double-buffered).  [review #4]
            pl.BlockSpec((Tc * Bp, F_in), lambda k: (k, 0)),
            pl.BlockSpec((Bp, 1), lambda k: (0, 0)),            # seq_len (int32)
            pl.BlockSpec((Bp, H), lambda k: (0, 0)),             # h0
            pl.BlockSpec((Bp, H), lambda k: (0, 0)),             # c0
            pl.BlockSpec((F_in, 4 * H), lambda k: (0, 0)),        # W_ih^T (bf16)
            pl.BlockSpec((H, 4 * H), lambda k: (0, 0)),           # W_hh^T (bf16)
            pl.BlockSpec((1, 4 * H), lambda k: (0, 0)),           # b_ih + b_hh (f32)
            pl.BlockSpec((H, out_feature), lambda k: (0, 0)),     # fc weight^T (f32)
            pl.BlockSpec((1, out_feature), lambda k: (0, 0)),     # fc bias (f32)
        ],
        out_specs=[
            pl.BlockSpec((Bp, out_feature), lambda k: (0, 0)),
            pl.BlockSpec((Bp, H), lambda k: (0, 0)),
            pl.BlockSpec((Bp, H), lambda k: (0, 0)),
        ],
        scratch_shapes=[
            pltpu.VMEM((Tc * Bp, 4 * H), jnp.float32),   # per-chunk input projection
            pltpu.VMEM((Bp, H), jnp.float32),            # h carry across chunks
            pltpu.VMEM((Bp, H), jnp.float32),            # c carry across chunks
            pltpu.VMEM((Bp, H), jnp.float32),            # last-valid-h carry
        ])

    # NOTE(v7x): when Bp >= 16 add a leading size-2 "parallel" batch axis to split the
    # independent sequences across the two TensorCores; not done here (Bp == 8).  [review #8]
    return pl.pallas_call(
        kernel,
        out_shape=(
            jax.ShapeDtypeStruct((Bp, out_feature), jnp.float32),
            jax.ShapeDtypeStruct((Bp, H), jnp.float32),
            jax.ShapeDtypeStruct((Bp, H), jnp.float32),
        ),
        grid_spec=grid_spec,
        compiler_params=pltpu.CompilerParams(
            dimension_semantics=("arbitrary",),          # time recurrence is sequential
            vmem_limit_bytes=vmem_limit),
    )(x2d, seq2d, h0, c0, wih_t, whh_t, bias, fcw_t, fcb)


# ----------------------------- Module wrapper -----------------------------
class AudioLSTMPallas:
    def __init__(self, n_feature=5, out_feature=5, n_hidden=128, n_layers=1,
                 drop_prob=0.1, key=jax.random.PRNGKey(0)):
        assert n_layers == 1, "reference module uses a single-layer LSTM"
        self.n_feature = n_feature
        self.out_feature = out_feature
        self.n_hidden = n_hidden
        self.n_layers = n_layers
        self.drop_prob = drop_prob

        k = 1.0 / jnp.sqrt(jnp.float32(n_hidden))
        ks = jax.random.split(key, 6)
        u = lambda kk, shape: jax.random.uniform(kk, shape, jnp.float32, -k, k)
        # PyTorch LSTM params: weight_ih (4H, F), weight_hh (4H, H), biases (4H,)
        self.w_ih = u(ks[0], (4 * n_hidden, n_feature))
        self.w_hh = u(ks[1], (4 * n_hidden, n_hidden))
        self.b_ih = u(ks[2], (4 * n_hidden,))
        self.b_hh = u(ks[3], (4 * n_hidden,))
        # fc: weight (out_feature, n_hidden), bias (out_feature,)
        self.fc_w = u(ks[4], (out_feature, n_hidden))
        self.fc_b = u(ks[5], (out_feature,))

        # Kernel-layout params prepared once (not per forward call).
        # bf16 MXU operands for the two big matmuls; f32 accumulation in-kernel.  [review #2]
        self.wih_t = self.w_ih.T.astype(jnp.bfloat16)               # (F, 4H) bf16
        self.whh_t = self.w_hh.T.astype(jnp.bfloat16)               # (H, 4H) bf16
        self.bias = (self.b_ih + self.b_hh).reshape(1, 4 * n_hidden)  # f32
        self.fcw_t = self.fc_w.T                                     # (H, OUT) f32 (tiny matmul)
        self.fcb = self.fc_b.reshape(1, -1)                          # (1, OUT) f32

    def init_hidden(self, batch_size):
        z = jnp.zeros((self.n_layers, batch_size, self.n_hidden), jnp.float32)
        return (z, z)

    def __call__(self, x, seq_len, hidden):
        """x: (B, T, F) batch_first, seq_len: (B,) int, hidden: ((1,B,H),(1,B,H)).
        Note: seq_len is clamped into [1, T] inside the kernel (PyTorch would wrap/index-error
        on out-of-range values)."""
        B, T, F = x.shape
        H = self.n_hidden
        Bp = max(8, ((B + 7) // 8) * 8)                 # pad batch to sublane multiple

        # Time-chunk size: keep the per-chunk input-projection scratch to ~4 MiB, and let the
        # chunk grid stream x / bound VMEM independently of T.  [review #3/#4]
        bytes_per_step = Bp * 4 * H * 4
        Tc = max(1, min(T, 256, (4 * 1024 * 1024) // bytes_per_step))
        n_chunks = -(-T // Tc)
        T_pad = n_chunks * Tc

        h0 = hidden[0][0]                               # (B, H)
        c0 = hidden[1][0]                               # (B, H)

        x_tm = jnp.transpose(x, (1, 0, 2))              # (T, B, F) time-major
        x_tm = jnp.pad(x_tm, ((0, T_pad - T), (0, Bp - B), (0, 0)))
        x2d = x_tm.reshape(T_pad * Bp, F).astype(jnp.bfloat16)   # rows grouped by timestep
        h0p = jnp.pad(h0, ((0, Bp - B), (0, 0)))
        c0p = jnp.pad(c0, ((0, Bp - B), (0, 0)))
        seq2d = jnp.pad(seq_len.astype(jnp.int32).reshape(B, 1),
                        ((0, Bp - B), (0, 0)), constant_values=1)

        out_p, hn_p, cn_p = audio_lstm_forward(
            x2d, seq2d, h0p, c0p, self.wih_t, self.whh_t, self.bias,
            self.fcw_t, self.fcb,
            seq_length=T, chunk=Tc, batch_pad=Bp, hidden=H,
            out_feature=self.out_feature)

        out = out_p[:B]                                 # (B, out_feature)
        l_hidden = (hn_p[:B][None, :, :], cn_p[:B][None, :, :])   # (n_layers, B, H) each
        return out, l_hidden


# ----------------------------- pure-JAX reference (for correctness check) -----------------------------
def _reference_forward(model, x, seq_len, hidden):
    B, T, _ = x.shape
    H = model.n_hidden
    hi = jax.lax.Precision.HIGHEST
    h = hidden[0][0]
    c = hidden[1][0]
    b = model.b_ih + model.b_hh
    outs = []
    for t in range(T):
        g = (jnp.dot(x[:, t, :], model.w_ih.T, precision=hi)
             + jnp.dot(h, model.w_hh.T, precision=hi) + b)
        i_g = jax.nn.sigmoid(g[:, 0 * H:1 * H])
        f_g = jax.nn.sigmoid(g[:, 1 * H:2 * H])
        g_g = jnp.tanh(g[:, 2 * H:3 * H])
        o_g = jax.nn.sigmoid(g[:, 3 * H:4 * H])
        c = f_g * c + i_g * g_g
        h = o_g * jnp.tanh(c)
        outs.append(h)
    l_out = jnp.stack(outs, axis=1)                                  # (B, T, H)
    last = l_out[jnp.arange(B), seq_len - 1]
    out = jnp.dot(last, model.fc_w.T, precision=hi) + model.fc_b
    return out, (h[None], c[None])


if __name__ == "__main__":
    B, T, F_IN, H, OUT = 2, 8, 5, 128, 5                 # n_hidden=128 matches the module default

    model = AudioLSTMPallas(n_feature=F_IN, out_feature=OUT, n_hidden=H, n_layers=1,
                            drop_prob=0.1, key=jax.random.PRNGKey(0))

    kx, _ = jax.random.split(jax.random.PRNGKey(0))
    x = jax.random.normal(kx, (B, T, F_IN), jnp.float32)  # batch_first like PyTorch
    seq_len = jnp.array([T, 5], dtype=jnp.int32)          # per-example valid lengths
    hidden = model.init_hidden(B)

    out, (h_n, c_n) = model(x, seq_len, hidden)
    jax.block_until_ready((out, h_n, c_n))

    assert out.shape == (B, OUT)
    assert h_n.shape == (1, B, H) and c_n.shape == (1, B, H)

    ref_out, (ref_h, ref_c) = _reference_forward(model, x, seq_len, hidden)
    # Tolerances reflect bf16 matmul operands (f32 accumulation) vs the f32 reference.
    assert jnp.allclose(out, ref_out, atol=2e-2, rtol=2e-2), "fc output mismatch vs reference"
    assert jnp.allclose(h_n, ref_h, atol=2e-2, rtol=2e-2), "h_n mismatch vs reference"
    assert jnp.allclose(c_n, ref_c, atol=2e-2, rtol=2e-2), "c_n mismatch vs reference"

    print("KERNEL_OK")
</pallas_src>

<mosaic_0001>
module attributes {stable_mosaic.version = 11 : i64} {
  func.func @_audio_lstm_kernel(%arg0: i32, %arg1: memref<64x5xbf16, #tpu.memory_space<vmem>>, %arg2: memref<8x1xi32, #tpu.memory_space<vmem>>, %arg3: memref<8x128xf32, #tpu.memory_space<vmem>>, %arg4: memref<8x128xf32, #tpu.memory_space<vmem>>, %arg5: memref<5x512xbf16, #tpu.memory_space<vmem>>, %arg6: memref<128x512xbf16, #tpu.memory_space<vmem>>, %arg7: memref<1x512xf32, #tpu.memory_space<vmem>>, %arg8: memref<128x5xf32, #tpu.memory_space<vmem>>, %arg9: memref<1x5xf32, #tpu.memory_space<vmem>>, %arg10: memref<8x5xf32, #tpu.memory_space<vmem>>, %arg11: memref<8x128xf32, #tpu.memory_space<vmem>>, %arg12: memref<8x128xf32, #tpu.memory_space<vmem>>, %arg13: memref<64x512xf32, #tpu.memory_space<vmem>>, %arg14: memref<8x128xf32, #tpu.memory_space<vmem>>, %arg15: memref<8x128xf32, #tpu.memory_space<vmem>>, %arg16: memref<8x128xf32, #tpu.memory_space<vmem>>) attributes {dimension_semantics = [#tpu.dimension_semantics<arbitrary>], iteration_bounds = array<i64: 1>, scalar_prefetch = 0 : i64, scratch_operands = 4 : i64, tpu.core_type = #tpu.core_type<tc>, window_params = [{transform_indices = @transform_0, window_bounds = array<i64: 64, 5>}, {pipeline_mode = #tpu.pipeline_mode<synchronous>, transform_indices = @transform_1, window_bounds = array<i64: 8, 1>}, {pipeline_mode = #tpu.pipeline_mode<synchronous>, transform_indices = @transform_2, window_bounds = array<i64: 8, 128>}, {pipeline_mode = #tpu.pipeline_mode<synchronous>, transform_indices = @transform_3, window_bounds = array<i64: 8, 128>}, {pipeline_mode = #tpu.pipeline_mode<synchronous>, transform_indices = @transform_4, window_bounds = array<i64: 5, 512>}, {pipeline_mode = #tpu.pipeline_mode<synchronous>, transform_indices = @transform_5, window_bounds = array<i64: 128, 512>}, {pipeline_mode = #tpu.pipeline_mode<synchronous>, transform_indices = @transform_6, window_bounds = array<i64: 1, 512>}, {pipeline_mode = #tpu.pipeline_mode<synchronous>, transform_indices = @transform_7, window_bounds = array<i64: 128, 5>}, {pipeline_mode = #tpu.pipeline_mode<synchronous>, transform_indices = @transform_8, window_bounds = array<i64: 1, 5>}, {pipeline_mode = #tpu.pipeline_mode<synchronous>, transform_indices = @transform_9, window_bounds = array<i64: 8, 5>}, {pipeline_mode = #tpu.pipeline_mode<synchronous>, transform_indices = @transform_10, window_bounds = array<i64: 8, 128>}, {pipeline_mode = #tpu.pipeline_mode<synchronous>, transform_indices = @transform_11, window_bounds = array<i64: 8, 128>}]} {
    %c0_i32 = arith.constant 0 : i32
    %0 = arith.cmpi eq, %arg0, %c0_i32 : i32
    %1 = arith.extui %0 : i1 to i32
    %c0_i32_0 = arith.constant 0 : i32
    %2 = arith.cmpi ne, %1, %c0_i32_0 : i32
    scf.if %2 {
      %c0_148 = arith.constant 0 : index
      %c0_149 = arith.constant 0 : index
      %394 = vector.load %arg3[%c0_148, %c0_149] : memref<8x128xf32, #tpu.memory_space<vmem>>, vector<8x128xf32>
      %c0_150 = arith.constant 0 : index
      %c0_151 = arith.constant 0 : index
      %395 = vector.load %arg14[%c0_150, %c0_151] : memref<8x128xf32, #tpu.memory_space<vmem>>, vector<8x128xf32>
      tpu.vector_store %arg14[%c0_150, %c0_151], %394 {strides = array<i32>} : memref<8x128xf32, #tpu.memory_space<vmem>>, vector<8x128xf32>,
      %c0_152 = arith.constant 0 : index
      %c0_153 = arith.constant 0 : index
      %396 = vector.load %arg4[%c0_152, %c0_153] : memref<8x128xf32, #tpu.memory_space<vmem>>, vector<8x128xf32>
      %c0_154 = arith.constant 0 : index
      %c0_155 = arith.constant 0 : index
      %397 = vector.load %arg15[%c0_154, %c0_155] : memref<8x128xf32, #tpu.memory_space<vmem>>, vector<8x128xf32>
      tpu.vector_store %arg15[%c0_154, %c0_155], %396 {strides = array<i32>} : memref<8x128xf32, #tpu.memory_space<vmem>>, vector<8x128xf32>,
      %cst_156 = arith.constant 0.000000e+00 : f32
      %398 = vector.broadcast %cst_156 : f32 to vector<8x128xf32>
      %c0_157 = arith.constant 0 : index
      %c0_158 = arith.constant 0 : index
      %399 = vector.load %arg16[%c0_157, %c0_158] : memref<8x128xf32, #tpu.memory_space<vmem>>, vector<8x128xf32>
      tpu.vector_store %arg16[%c0_157, %c0_158], %398 {strides = array<i32>} : memref<8x128xf32, #tpu.memory_space<vmem>>, vector<8x128xf32>,
    } else {
    }
    %c0 = arith.constant 0 : index
    %c0_1 = arith.constant 0 : index
    %3 = vector.load %arg1[%c0, %c0_1] : memref<64x5xbf16, #tpu.memory_space<vmem>>, vector<64x5xbf16>
    %c0_2 = arith.constant 0 : index
    %c0_3 = arith.constant 0 : index
    %4 = vector.load %arg5[%c0_2, %c0_3] : memref<5x512xbf16, #tpu.memory_space<vmem>>, vector<5x512xbf16>
    %cst = arith.constant dense<0.000000e+00> : vector<64x512xf32>
    %5 = tpu.matmul %3, %4, %cst {dimension_numbers = #tpu.dot_dimension_numbers<[1], [0], [0], [1], [0, 0, 1, 1], [], []>} : vector<64x5xbf16>, vector<5x512xbf16>, vector<64x512xf32> -> vector<64x512xf32>
    %c0_4 = arith.constant 0 : index
    %c0_5 = arith.constant 0 : index
    %6 = vector.load %arg7[%c0_4, %c0_5] : memref<1x512xf32, #tpu.memory_space<vmem>>, vector<1x512xf32>
    %7 = vector.broadcast %6 : vector<1x512xf32> to vector<64x512xf32>
    %8 = arith.addf %5, %7 : vector<64x512xf32>
    %c0_6 = arith.constant 0 : index
    %c0_7 = arith.constant 0 : index
    %9 = vector.load %arg13[%c0_6, %c0_7] : memref<64x512xf32, #tpu.memory_space<vmem>>, vector<64x512xf32>
    tpu.vector_store %arg13[%c0_6, %c0_7], %8 {strides = array<i32>} : memref<64x512xf32, #tpu.memory_space<vmem>>, vector<64x512xf32>,
    %c0_8 = arith.constant 0 : index
    %c0_9 = arith.constant 0 : index
    %10 = vector.load %arg2[%c0_8, %c0_9] : memref<8x1xi32, #tpu.memory_space<vmem>>, vector<8x1xi32>
    %c1_i32 = arith.constant 1 : i32
    %11 = vector.broadcast %c1_i32 : i32 to vector<8x1xi32>
    %12 = arith.subi %10, %11 : vector<8x1xi32>
    %c0_i32_10 = arith.constant 0 : i32
    %c7_i32 = arith.constant 7 : i32
    %13 = vector.broadcast %c0_i32_10 : i32 to vector<8x1xi32>
    %14 = arith.maxsi %13, %12 : vector<8x1xi32>
    %15 = vector.broadcast %c7_i32 : i32 to vector<8x1xi32>
    %16 = arith.minsi %15, %14 : vector<8x1xi32>
    %c0_11 = arith.constant 0 : index
    %c0_12 = arith.constant 0 : index
    %17 = vector.load %arg14[%c0_11, %c0_12] : memref<8x128xf32, #tpu.memory_space<vmem>>, vector<8x128xf32>
    %c0_13 = arith.constant 0 : index
    %c0_14 = arith.constant 0 : index
    %18 = vector.load %arg15[%c0_13, %c0_14] : memref<8x128xf32, #tpu.memory_space<vmem>>, vector<8x128xf32>
    %c0_15 = arith.constant 0 : index
    %c0_16 = arith.constant 0 : index
    %19 = vector.load %arg16[%c0_15, %c0_16] : memref<8x128xf32, #tpu.memory_space<vmem>>, vector<8x128xf32>
    %c0_i32_17 = arith.constant 0 : i32
    %c8_i32 = arith.constant 8 : i32
    %20 = arith.muli %arg0, %c8_i32 : i32
    %21 = arith.addi %20, %c0_i32_17 : i32
    %c8_i32_18 = arith.constant 8 : i32
    %22 = arith.muli %c0_i32_17, %c8_i32_18 : i32
    %23 = tpu.assume_multiple %22, 8 : i32
    %24 = arith.index_cast %23 : i32 to index
    %c0_19 = arith.constant 0 : index
    %25 = vector.load %arg13[%24, %c0_19] : memref<64x512xf32, #tpu.memory_space<vmem>>, vector<8x512xf32>
    %26 = arith.truncf %17 : vector<8x128xf32> to vector<8x128xbf16>
    %c0_20 = arith.constant 0 : index
    %c0_21 = arith.constant 0 : index
    %27 = vector.load %arg6[%c0_20, %c0_21] : memref<128x512xbf16, #tpu.memory_space<vmem>>, vector<128x512xbf16>
    %cst_22 = arith.constant dense<0.000000e+00> : vector<8x512xf32>
    %28 = tpu.matmul %26, %27, %cst_22 {dimension_numbers = #tpu.dot_dimension_numbers<[1], [0], [0], [1], [0, 0, 1, 1], [], []>} : vector<8x128xbf16>, vector<128x512xbf16>, vector<8x512xf32> -> vector<8x512xf32>
    %29 = arith.addf %25, %28 : vector<8x512xf32>
    %30 = vector.extract_strided_slice %29 {offsets = [0, 0], sizes = [8, 128], strides = [1, 1]} : vector<8x512xf32> to vector<8x128xf32>
    %cst_23 = arith.constant 5.000000e-01 : f32
    %31 = vector.broadcast %cst_23 : f32 to vector<8x128xf32>
    %32 = arith.mulf %31, %30 : vector<8x128xf32>
    %33 = math.tanh %32 : vector<8x128xf32>
    %cst_24 = arith.constant 5.000000e-01 : f32
    %34 = vector.broadcast %cst_24 : f32 to vector<8x128xf32>
    %35 = arith.mulf %34, %33 : vector<8x128xf32>
    %cst_25 = arith.constant 5.000000e-01 : f32
    %36 = vector.broadcast %cst_25 : f32 to vector<8x128xf32>
    %37 = arith.addf %35, %36 : vector<8x128xf32>
    %38 = vector.extract_strided_slice %29 {offsets = [0, 128], sizes = [8, 128], strides = [1, 1]} : vector<8x512xf32> to vector<8x128xf32>
    %cst_26 = arith.constant 5.000000e-01 : f32
    %39 = vector.broadcast %cst_26 : f32 to vector<8x128xf32>
    %40 = arith.mulf %39, %38 : vector<8x128xf32>
    %41 = math.tanh %40 : vector<8x128xf32>
    %cst_27 = arith.constant 5.000000e-01 : f32
    %42 = vector.broadcast %cst_27 : f32 to vector<8x128xf32>
    %43 = arith.mulf %42, %41 : vector<8x128xf32>
    %cst_28 = arith.constant 5.000000e-01 : f32
    %44 = vector.broadcast %cst_28 : f32 to vector<8x128xf32>
    %45 = arith.addf %43, %44 : vector<8x128xf32>
    %46 = vector.extract_strided_slice %29 {offsets = [0, 256], sizes = [8, 128], strides = [1, 1]} : vector<8x512xf32> to vector<8x128xf32>
    %47 = math.tanh %46 : vector<8x128xf32>
    %48 = vector.extract_strided_slice %29 {offsets = [0, 384], sizes = [8, 128], strides = [1, 1]} : vector<8x512xf32> to vector<8x128xf32>
    %cst_29 = arith.constant 5.000000e-01 : f32
    %49 = vector.broadcast %cst_29 : f32 to vector<8x128xf32>
    %50 = arith.mulf %49, %48 : vector<8x128xf32>
    %51 = math.tanh %50 : vector<8x128xf32>
    %cst_30 = arith.constant 5.000000e-01 : f32
    %52 = vector.broadcast %cst_30 : f32 to vector<8x128xf32>
    %53 = arith.mulf %52, %51 : vector<8x128xf32>
    %cst_31 = arith.constant 5.000000e-01 : f32
    %54 = vector.broadcast %cst_31 : f32 to vector<8x128xf32>
    %55 = arith.addf %53, %54 : vector<8x128xf32>
    %56 = arith.mulf %45, %18 : vector<8x128xf32>
    %57 = arith.mulf %37, %47 : vector<8x128xf32>
    %58 = arith.addf %56, %57 : vector<8x128xf32>
    %59 = math.tanh %58 : vector<8x128xf32>
    %60 = arith.mulf %55, %59 : vector<8x128xf32>
    %61 = vector.broadcast %21 : i32 to vector<8x1xi32>
    %62 = arith.cmpi eq, %16, %61 : vector<8x1xi32>
    %63 = vector.shape_cast %62 : vector<8x1xi1> to vector<8x1xi1>
    %64 = vector.broadcast %63 : vector<8x1xi1> to vector<8x128xi1>
    %65 = arith.select %64, %60, %19 : vector<8x128xi1>, vector<8x128xf32>
    %c1_i32_32 = arith.constant 1 : i32
    %c8_i32_33 = arith.constant 8 : i32
    %66 = arith.muli %arg0, %c8_i32_33 : i32
    %67 = arith.addi %66, %c1_i32_32 : i32
    %c8_i32_34 = arith.constant 8 : i32
    %68 = arith.muli %c1_i32_32, %c8_i32_34 : i32
    %69 = tpu.assume_multiple %68, 8 : i32
    %70 = arith.index_cast %69 : i32 to index
    %c0_35 = arith.constant 0 : index
    %71 = vector.load %arg13[%70, %c0_35] : memref<64x512xf32, #tpu.memory_space<vmem>>, vector<8x512xf32>
    %72 = arith.truncf %60 : vector<8x128xf32> to vector<8x128xbf16>
    %c0_36 = arith.constant 0 : index
    %c0_37 = arith.constant 0 : index
    %73 = vector.load %arg6[%c0_36, %c0_37] : memref<128x512xbf16, #tpu.memory_space<vmem>>, vector<128x512xbf16>
    %cst_38 = arith.constant dense<0.000000e+00> : vector<8x512xf32>
    %74 = tpu.matmul %72, %73, %cst_38 {dimension_numbers = #tpu.dot_dimension_numbers<[1], [0], [0], [1], [0, 0, 1, 1], [], []>} : vector<8x128xbf16>, vector<128x512xbf16>, vector<8x512xf32> -> vector<8x512xf32>
    %75 = arith.addf %71, %74 : vector<8x512xf32>
    %76 = vector.extract_strided_slice %75 {offsets = [0, 0], sizes = [8, 128], strides = [1, 1]} : vector<8x512xf32> to vector<8x128xf32>
    %cst_39 = arith.constant 5.000000e-01 : f32
    %77 = vector.broadcast %cst_39 : f32 to vector<8x128xf32>
    %78 = arith.mulf %77, %76 : vector<8x128xf32>
    %79 = math.tanh %78 : vector<8x128xf32>
    %cst_40 = arith.constant 5.000000e-01 : f32
    %80 = vector.broadcast %cst_40 : f32 to vector<8x128xf32>
    %81 = arith.mulf %80, %79 : vector<8x128xf32>
    %cst_41 = arith.constant 5.000000e-01 : f32
    %82 = vector.broadcast %cst_41 : f32 to vector<8x128xf32>
    %83 = arith.addf %81, %82 : vector<8x128xf32>
    %84 = vector.extract_strided_slice %75 {offsets = [0, 128], sizes = [8, 128], strides = [1, 1]} : vector<8x512xf32> to vector<8x128xf32>
    %cst_42 = arith.constant 5.000000e-01 : f32
    %85 = vector.broadcast %cst_42 : f32 to vector<8x128xf32>
    %86 = arith.mulf %85, %84 : vector<8x128xf32>
    %87 = math.tanh %86 : vector<8x128xf32>
    %cst_43 = arith.constant 5.000000e-01 : f32
    %88 = vector.broadcast %cst_43 : f32 to vector<8x128xf32>
    %89 = arith.mulf %88, %87 : vector<8x128xf32>
    %cst_44 = arith.constant 5.000000e-01 : f32
    %90 = vector.broadcast %cst_44 : f32 to vector<8x128xf32>
    %91 = arith.addf %89, %90 : vector<8x128xf32>
    %92 = vector.extract_strided_slice %75 {offsets = [0, 256], sizes = [8, 128], strides = [1, 1]} : vector<8x512xf32> to vector<8x128xf32>
    %93 = math.tanh %92 : vector<8x128xf32>
    %94 = vector.extract_strided_slice %75 {offsets = [0, 384], sizes = [8, 128], strides = [1, 1]} : vector<8x512xf32> to vector<8x128xf32>
    %cst_45 = arith.constant 5.000000e-01 : f32
    %95 = vector.broadcast %cst_45 : f32 to vector<8x128xf32>
    %96 = arith.mulf %95, %94 : vector<8x128xf32>
    %97 = math.tanh %96 : vector<8x128xf32>
    %cst_46 = arith.constant 5.000000e-01 : f32
    %98 = vector.broadcast %cst_46 : f32 to vector<8x128xf32>
    %99 = arith.mulf %98, %97 : vector<8x128xf32>
    %cst_47 = arith.constant 5.000000e-01 : f32
    %100 = vector.broadcast %cst_47 : f32 to vector<8x128xf32>
    %101 = arith.addf %99, %100 : vector<8x128xf32>
    %102 = arith.mulf %91, %58 : vector<8x128xf32>
    %103 = arith.mulf %83, %93 : vector<8x128xf32>
    %104 = arith.addf %102, %103 : vector<8x128xf32>
    %105 = math.tanh %104 : vector<8x128xf32>
    %106 = arith.mulf %101, %105 : vector<8x128xf32>
    %107 = vector.broadcast %67 : i32 to vector<8x1xi32>
    %108 = arith.cmpi eq, %16, %107 : vector<8x1xi32>
    %109 = vector.shape_cast %108 : vector<8x1xi1> to vector<8x1xi1>
    %110 = vector.broadcast %109 : vector<8x1xi1> to vector<8x128xi1>
    %111 = arith.select %110, %106, %65 : vector<8x128xi1>, vector<8x128xf32>
    %c2_i32 = arith.constant 2 : i32
    %c8_i32_48 = arith.constant 8 : i32
    %112 = arith.muli %arg0, %c8_i32_48 : i32
    %113 = arith.addi %112, %c2_i32 : i32
    %c8_i32_49 = arith.constant 8 : i32
    %114 = arith.muli %c2_i32, %c8_i32_49 : i32
    %115 = tpu.assume_multiple %114, 8 : i32
    %116 = arith.index_cast %115 : i32 to index
    %c0_50 = arith.constant 0 : index
    %117 = vector.load %arg13[%116, %c0_50] : memref<64x512xf32, #tpu.memory_space<vmem>>, vector<8x512xf32>
    %118 = arith.truncf %106 : vector<8x128xf32> to vector<8x128xbf16>
    %c0_51 = arith.constant 0 : index
    %c0_52 = arith.constant 0 : index
    %119 = vector.load %arg6[%c0_51, %c0_52] : memref<128x512xbf16, #tpu.memory_space<vmem>>, vector<128x512xbf16>
    %cst_53 = arith.constant dense<0.000000e+00> : vector<8x512xf32>
    %120 = tpu.matmul %118, %119, %cst_53 {dimension_numbers = #tpu.dot_dimension_numbers<[1], [0], [0], [1], [0, 0, 1, 1], [], []>} : vector<8x128xbf16>, vector<128x512xbf16>, vector<8x512xf32> -> vector<8x512xf32>
    %121 = arith.addf %117, %120 : vector<8x512xf32>
    %122 = vector.extract_strided_slice %121 {offsets = [0, 0], sizes = [8, 128], strides = [1, 1]} : vector<8x512xf32> to vector<8x128xf32>
    %cst_54 = arith.constant 5.000000e-01 : f32
    %123 = vector.broadcast %cst_54 : f32 to vector<8x128xf32>
    %124 = arith.mulf %123, %122 : vector<8x128xf32>
    %125 = math.tanh %124 : vector<8x128xf32>
    %cst_55 = arith.constant 5.000000e-01 : f32
    %126 = vector.broadcast %cst_55 : f32 to vector<8x128xf32>
    %127 = arith.mulf %126, %125 : vector<8x128xf32>
    %cst_56 = arith.constant 5.000000e-01 : f32
    %128 = vector.broadcast %cst_56 : f32 to vector<8x128xf32>
    %129 = arith.addf %127, %128 : vector<8x128xf32>
    %130 = vector.extract_strided_slice %121 {offsets = [0, 128], sizes = [8, 128], strides = [1, 1]} : vector<8x512xf32> to vector<8x128xf32>
    %cst_57 = arith.constant 5.000000e-01 : f32
    %131 = vector.broadcast %cst_57 : f32 to vector<8x128xf32>
    %132 = arith.mulf %131, %130 : vector<8x128xf32>
    %133 = math.tanh %132 : vector<8x128xf32>
    %cst_58 = arith.constant 5.000000e-01 : f32
    %134 = vector.broadcast %cst_58 : f32 to vector<8x128xf32>
    %135 = arith.mulf %134, %133 : vector<8x128xf32>
    %cst_59 = arith.constant 5.000000e-01 : f32
    %136 = vector.broadcast %cst_59 : f32 to vector<8x128xf32>
    %137 = arith.addf %135, %136 : vector<8x128xf32>
    %138 = vector.extract_strided_slice %121 {offsets = [0, 256], sizes = [8, 128], strides = [1, 1]} : vector<8x512xf32> to vector<8x128xf32>
    %139 = math.tanh %138 : vector<8x128xf32>
    %140 = vector.extract_strided_slice %121 {offsets = [0, 384], sizes = [8, 128], strides = [1, 1]} : vector<8x512xf32> to vector<8x128xf32>
    %cst_60 = arith.constant 5.000000e-01 : f32
    %141 = vector.broadcast %cst_60 : f32 to vector<8x128xf32>
    %142 = arith.mulf %141, %140 : vector<8x128xf32>
    %143 = math.tanh %142 : vector<8x128xf32>
    %cst_61 = arith.constant 5.000000e-01 : f32
    %144 = vector.broadcast %cst_61 : f32 to vector<8x128xf32>
    %145 = arith.mulf %144, %143 : vector<8x128xf32>
    %cst_62 = arith.constant 5.000000e-01 : f32
    %146 = vector.broadcast %cst_62 : f32 to vector<8x128xf32>
    %147 = arith.addf %145, %146 : vector<8x128xf32>
    %148 = arith.mulf %137, %104 : vector<8x128xf32>
    %149 = arith.mulf %129, %139 : vector<8x128xf32>
    %150 = arith.addf %148, %149 : vector<8x128xf32>
    %151 = math.tanh %150 : vector<8x128xf32>
    %152 = arith.mulf %147, %151 : vector<8x128xf32>
    %153 = vector.broadcast %113 : i32 to vector<8x1xi32>
    %154 = arith.cmpi eq, %16, %153 : vector<8x1xi32>
    %155 = vector.shape_cast %154 : vector<8x1xi1> to vector<8x1xi1>
    %156 = vector.broadcast %155 : vector<8x1xi1> to vector<8x128xi1>
    %157 = arith.select %156, %152, %111 : vector<8x128xi1>, vector<8x128xf32>
    %c3_i32 = arith.constant 3 : i32
    %c8_i32_63 = arith.constant 8 : i32
    %158 = arith.muli %arg0, %c8_i32_63 : i32
    %159 = arith.addi %158, %c3_i32 : i32
    %c8_i32_64 = arith.constant 8 : i32
    %160 = arith.muli %c3_i32, %c8_i32_64 : i32
    %161 = tpu.assume_multiple %160, 8 : i32
    %162 = arith.index_cast %161 : i32 to index
    %c0_65 = arith.constant 0 : index
    %163 = vector.load %arg13[%162, %c0_65] : memref<64x512xf32, #tpu.memory_space<vmem>>, vector<8x512xf32>
    %164 = arith.truncf %152 : vector<8x128xf32> to vector<8x128xbf16>
    %c0_66 = arith.constant 0 : index
    %c0_67 = arith.constant 0 : index
    %165 = vector.load %arg6[%c0_66, %c0_67] : memref<128x512xbf16, #tpu.memory_space<vmem>>, vector<128x512xbf16>
    %cst_68 = arith.constant dense<0.000000e+00> : vector<8x512xf32>
    %166 = tpu.matmul %164, %165, %cst_68 {dimension_numbers = #tpu.dot_dimension_numbers<[1], [0], [0], [1], [0, 0, 1, 1], [], []>} : vector<8x128xbf16>, vector<128x512xbf16>, vector<8x512xf32> -> vector<8x512xf32>
    %167 = arith.addf %163, %166 : vector<8x512xf32>
    %168 = vector.extract_strided_slice %167 {offsets = [0, 0], sizes = [8, 128], strides = [1, 1]} : vector<8x512xf32> to vector<8x128xf32>
    %cst_69 = arith.constant 5.000000e-01 : f32
    %169 = vector.broadcast %cst_69 : f32 to vector<8x128xf32>
    %170 = arith.mulf %169, %168 : vector<8x128xf32>
    %171 = math.tanh %170 : vector<8x128xf32>
    %cst_70 = arith.constant 5.000000e-01 : f32
    %172 = vector.broadcast %cst_70 : f32 to vector<8x128xf32>
    %173 = arith.mulf %172, %171 : vector<8x128xf32>
    %cst_71 = arith.constant 5.000000e-01 : f32
    %174 = vector.broadcast %cst_71 : f32 to vector<8x128xf32>
    %175 = arith.addf %173, %174 : vector<8x128xf32>
    %176 = vector.extract_strided_slice %167 {offsets = [0, 128], sizes = [8, 128], strides = [1, 1]} : vector<8x512xf32> to vector<8x128xf32>
    %cst_72 = arith.constant 5.000000e-01 : f32
    %177 = vector.broadcast %cst_72 : f32 to vector<8x128xf32>
    %178 = arith.mulf %177, %176 : vector<8x128xf32>
    %179 = math.tanh %178 : vector<8x128xf32>
    %cst_73 = arith.constant 5.000000e-01 : f32
    %180 = vector.broadcast %cst_73 : f32 to vector<8x128xf32>
    %181 = arith.mulf %180, %179 : vector<8x128xf32>
    %cst_74 = arith.constant 5.000000e-01 : f32
    %182 = vector.broadcast %cst_74 : f32 to vector<8x128xf32>
    %183 = arith.addf %181, %182 : vector<8x128xf32>
    %184 = vector.extract_strided_slice %167 {offsets = [0, 256], sizes = [8, 128], strides = [1, 1]} : vector<8x512xf32> to vector<8x128xf32>
    %185 = math.tanh %184 : vector<8x128xf32>
    %186 = vector.extract_strided_slice %167 {offsets = [0, 384], sizes = [8, 128], strides = [1, 1]} : vector<8x512xf32> to vector<8x128xf32>
    %cst_75 = arith.constant 5.000000e-01 : f32
    %187 = vector.broadcast %cst_75 : f32 to vector<8x128xf32>
    %188 = arith.mulf %187, %186 : vector<8x128xf32>
    %189 = math.tanh %188 : vector<8x128xf32>
    %cst_76 = arith.constant 5.000000e-01 : f32
    %190 = vector.broadcast %cst_76 : f32 to vector<8x128xf32>
    %191 = arith.mulf %190, %189 : vector<8x128xf32>
    %cst_77 = arith.constant 5.000000e-01 : f32
    %192 = vector.broadcast %cst_77 : f32 to vector<8x128xf32>
    %193 = arith.addf %191, %192 : vector<8x128xf32>
    %194 = arith.mulf %183, %150 : vector<8x128xf32>
    %195 = arith.mulf %175, %185 : vector<8x128xf32>
    %196 = arith.addf %194, %195 : vector<8x128xf32>
    %197 = math.tanh %196 : vector<8x128xf32>
    %198 = arith.mulf %193, %197 : vector<8x128xf32>
    %199 = vector.broadcast %159 : i32 to vector<8x1xi32>
    %200 = arith.cmpi eq, %16, %199 : vector<8x1xi32>
    %201 = vector.shape_cast %200 : vector<8x1xi1> to vector<8x1xi1>
    %202 = vector.broadcast %201 : vector<8x1xi1> to vector<8x128xi1>
    %203 = arith.select %202, %198, %157 : vector<8x128xi1>, vector<8x128xf32>
    %c4_i32 = arith.constant 4 : i32
    %c8_i32_78 = arith.constant 8 : i32
    %204 = arith.muli %arg0, %c8_i32_78 : i32
    %205 = arith.addi %204, %c4_i32 : i32
    %c8_i32_79 = arith.constant 8 : i32
    %206 = arith.muli %c4_i32, %c8_i32_79 : i32
    %207 = tpu.assume_multiple %206, 8 : i32
    %208 = arith.index_cast %207 : i32 to index
    %c0_80 = arith.constant 0 : index
    %209 = vector.load %arg13[%208, %c0_80] : memref<64x512xf32, #tpu.memory_space<vmem>>, vector<8x512xf32>
    %210 = arith.truncf %198 : vector<8x128xf32> to vector<8x128xbf16>
    %c0_81 = arith.constant 0 : index
    %c0_82 = arith.constant 0 : index
    %211 = vector.load %arg6[%c0_81, %c0_82] : memref<128x512xbf16, #tpu.memory_space<vmem>>, vector<128x512xbf16>
    %cst_83 = arith.constant dense<0.000000e+00> : vector<8x512xf32>
    %212 = tpu.matmul %210, %211, %cst_83 {dimension_numbers = #tpu.dot_dimension_numbers<[1], [0], [0], [1], [0, 0, 1, 1], [], []>} : vector<8x128xbf16>, vector<128x512xbf16>, vector<8x512xf32> -> vector<8x512xf32>
    %213 = arith.addf %209, %212 : vector<8x512xf32>
    %214 = vector.extract_strided_slice %213 {offsets = [0, 0], sizes = [8, 128], strides = [1, 1]} : vector<8x512xf32> to vector<8x128xf32>
    %cst_84 = arith.constant 5.000000e-01 : f32
    %215 = vector.broadcast %cst_84 : f32 to vector<8x128xf32>
    %216 = arith.mulf %215, %214 : vector<8x128xf32>
    %217 = math.tanh %216 : vector<8x128xf32>
    %cst_85 = arith.constant 5.000000e-01 : f32
    %218 = vector.broadcast %cst_85 : f32 to vector<8x128xf32>
    %219 = arith.mulf %218, %217 : vector<8x128xf32>
    %cst_86 = arith.constant 5.000000e-01 : f32
    %220 = vector.broadcast %cst_86 : f32 to vector<8x128xf32>
    %221 = arith.addf %219, %220 : vector<8x128xf32>
    %222 = vector.extract_strided_slice %213 {offsets = [0, 128], sizes = [8, 128], strides = [1, 1]} : vector<8x512xf32> to vector<8x128xf32>
    %cst_87 = arith.constant 5.000000e-01 : f32
    %223 = vector.broadcast %cst_87 : f32 to vector<8x128xf32>
    %224 = arith.mulf %223, %222 : vector<8x128xf32>
    %225 = math.tanh %224 : vector<8x128xf32>
    %cst_88 = arith.constant 5.000000e-01 : f32
    %226 = vector.broadcast %cst_88 : f32 to vector<8x128xf32>
    %227 = arith.mulf %226, %225 : vector<8x128xf32>
    %cst_89 = arith.constant 5.000000e-01 : f32
    %228 = vector.broadcast %cst_89 : f32 to vector<8x128xf32>
    %229 = arith.addf %227, %228 : vector<8x128xf32>
    %230 = vector.extract_strided_slice %213 {offsets = [0, 256], sizes = [8, 128], strides = [1, 1]} : vector<8x512xf32> to vector<8x128xf32>
    %231 = math.tanh %230 : vector<8x128xf32>
    %232 = vector.extract_strided_slice %213 {offsets = [0, 384], sizes = [8, 128], strides = [1, 1]} : vector<8x512xf32> to vector<8x128xf32>
    %cst_90 = arith.constant 5.000000e-01 : f32
    %233 = vector.broadcast %cst_90 : f32 to vector<8x128xf32>
    %234 = arith.mulf %233, %232 : vector<8x128xf32>
    %235 = math.tanh %234 : vector<8x128xf32>
    %cst_91 = arith.constant 5.000000e-01 : f32
    %236 = vector.broadcast %cst_91 : f32 to vector<8x128xf32>
    %237 = arith.mulf %236, %235 : vector<8x128xf32>
    %cst_92 = arith.constant 5.000000e-01 : f32
    %238 = vector.broadcast %cst_92 : f32 to vector<8x128xf32>
    %239 = arith.addf %237, %238 : vector<8x128xf32>
    %240 = arith.mulf %229, %196 : vector<8x128xf32>
    %241 = arith.mulf %221, %231 : vector<8x128xf32>
    %242 = arith.addf %240, %241 : vector<8x128xf32>
    %243 = math.tanh %242 : vector<8x128xf32>
    %244 = arith.mulf %239, %243 : vector<8x128xf32>
    %245 = vector.broadcast %205 : i32 to vector<8x1xi32>
    %246 = arith.cmpi eq, %16, %245 : vector<8x1xi32>
    %247 = vector.shape_cast %246 : vector<8x1xi1> to vector<8x1xi1>
    %248 = vector.broadcast %247 : vector<8x1xi1> to vector<8x128xi1>
    %249 = arith.select %248, %244, %203 : vector<8x128xi1>, vector<8x128xf32>
    %c5_i32 = arith.constant 5 : i32
    %c8_i32_93 = arith.constant 8 : i32
    %250 = arith.muli %arg0, %c8_i32_93 : i32
    %251 = arith.addi %250, %c5_i32 : i32
    %c8_i32_94 = arith.constant 8 : i32
    %252 = arith.muli %c5_i32, %c8_i32_94 : i32
    %253 = tpu.assume_multiple %252, 8 : i32
    %254 = arith.index_cast %253 : i32 to index
    %c0_95 = arith.constant 0 : index
    %255 = vector.load %arg13[%254, %c0_95] : memref<64x512xf32, #tpu.memory_space<vmem>>, vector<8x512xf32>
    %256 = arith.truncf %244 : vector<8x128xf32> to vector<8x128xbf16>
    %c0_96 = arith.constant 0 : index
    %c0_97 = arith.constant 0 : index
    %257 = vector.load %arg6[%c0_96, %c0_97] : memref<128x512xbf16, #tpu.memory_space<vmem>>, vector<128x512xbf16>
    %cst_98 = arith.constant dense<0.000000e+00> : vector<8x512xf32>
    %258 = tpu.matmul %256, %257, %cst_98 {dimension_numbers = #tpu.dot_dimension_numbers<[1], [0], [0], [1], [0, 0, 1, 1], [], []>} : vector<8x128xbf16>, vector<128x512xbf16>, vector<8x512xf32> -> vector<8x512xf32>
    %259 = arith.addf %255, %258 : vector<8x512xf32>
    %260 = vector.extract_strided_slice %259 {offsets = [0, 0], sizes = [8, 128], strides = [1, 1]} : vector<8x512xf32> to vector<8x128xf32>
    %cst_99 = arith.constant 5.000000e-01 : f32
    %261 = vector.broadcast %cst_99 : f32 to vector<8x128xf32>
    %262 = arith.mulf %261, %260 : vector<8x128xf32>
    %263 = math.tanh %262 : vector<8x128xf32>
    %cst_100 = arith.constant 5.000000e-01 : f32
    %264 = vector.broadcast %cst_100 : f32 to vector<8x128xf32>
    %265 = arith.mulf %264, %263 : vector<8x128xf32>
    %cst_101 = arith.constant 5.000000e-01 : f32
    %266 = vector.broadcast %cst_101 : f32 to vector<8x128xf32>
    %267 = arith.addf %265, %266 : vector<8x128xf32>
    %268 = vector.extract_strided_slice %259 {offsets = [0, 128], sizes = [8, 128], strides = [1, 1]} : vector<8x512xf32> to vector<8x128xf32>
    %cst_102 = arith.constant 5.000000e-01 : f32
    %269 = vector.broadcast %cst_102 : f32 to vector<8x128xf32>
    %270 = arith.mulf %269, %268 : vector<8x128xf32>
    %271 = math.tanh %270 : vector<8x128xf32>
    %cst_103 = arith.constant 5.000000e-01 : f32
    %272 = vector.broadcast %cst_103 : f32 to vector<8x128xf32>
    %273 = arith.mulf %272, %271 : vector<8x128xf32>
    %cst_104 = arith.constant 5.000000e-01 : f32
    %274 = vector.broadcast %cst_104 : f32 to vector<8x128xf32>
    %275 = arith.addf %273, %274 : vector<8x128xf32>
    %276 = vector.extract_strided_slice %259 {offsets = [0, 256], sizes = [8, 128], strides = [1, 1]} : vector<8x512xf32> to vector<8x128xf32>
    %277 = math.tanh %276 : vector<8x128xf32>
    %278 = vector.extract_strided_slice %259 {offsets = [0, 384], sizes = [8, 128], strides = [1, 1]} : vector<8x512xf32> to vector<8x128xf32>
    %cst_105 = arith.constant 5.000000e-01 : f32
    %279 = vector.broadcast %cst_105 : f32 to vector<8x128xf32>
    %280 = arith.mulf %279, %278 : vector<8x128xf32>
    %281 = math.tanh %280 : vector<8x128xf32>
    %cst_106 = arith.constant 5.000000e-01 : f32
    %282 = vector.broadcast %cst_106 : f32 to vector<8x128xf32>
    %283 = arith.mulf %282, %281 : vector<8x128xf32>
    %cst_107 = arith.constant 5.000000e-01 : f32
    %284 = vector.broadcast %cst_107 : f32 to vector<8x128xf32>
    %285 = arith.addf %283, %284 : vector<8x128xf32>
    %286 = arith.mulf %275, %242 : vector<8x128xf32>
    %287 = arith.mulf %267, %277 : vector<8x128xf32>
    %288 = arith.addf %286, %287 : vector<8x128xf32>
    %289 = math.tanh %288 : vector<8x128xf32>
    %290 = arith.mulf %285, %289 : vector<8x128xf32>
    %291 = vector.broadcast %251 : i32 to vector<8x1xi32>
    %292 = arith.cmpi eq, %16, %291 : vector<8x1xi32>
    %293 = vector.shape_cast %292 : vector<8x1xi1> to vector<8x1xi1>
    %294 = vector.broadcast %293 : vector<8x1xi1> to vector<8x128xi1>
    %295 = arith.select %294, %290, %249 : vector<8x128xi1>, vector<8x128xf32>
    %c6_i32 = arith.constant 6 : i32
    %c8_i32_108 = arith.constant 8 : i32
    %296 = arith.muli %arg0, %c8_i32_108 : i32
    %297 = arith.addi %296, %c6_i32 : i32
    %c8_i32_109 = arith.constant 8 : i32
    %298 = arith.muli %c6_i32, %c8_i32_109 : i32
    %299 = tpu.assume_multiple %298, 8 : i32
    %300 = arith.index_cast %299 : i32 to index
    %c0_110 = arith.constant 0 : index
    %301 = vector.load %arg13[%300, %c0_110] : memref<64x512xf32, #tpu.memory_space<vmem>>, vector<8x512xf32>
    %302 = arith.truncf %290 : vector<8x128xf32> to vector<8x128xbf16>
    %c0_111 = arith.constant 0 : index
    %c0_112 = arith.constant 0 : index
    %303 = vector.load %arg6[%c0_111, %c0_112] : memref<128x512xbf16, #tpu.memory_space<vmem>>, vector<128x512xbf16>
    %cst_113 = arith.constant dense<0.000000e+00> : vector<8x512xf32>
    %304 = tpu.matmul %302, %303, %cst_113 {dimension_numbers = #tpu.dot_dimension_numbers<[1], [0], [0], [1], [0, 0, 1, 1], [], []>} : vector<8x128xbf16>, vector<128x512xbf16>, vector<8x512xf32> -> vector<8x512xf32>
    %305 = arith.addf %301, %304 : vector<8x512xf32>
    %306 = vector.extract_strided_slice %305 {offsets = [0, 0], sizes = [8, 128], strides = [1, 1]} : vector<8x512xf32> to vector<8x128xf32>
    %cst_114 = arith.constant 5.000000e-01 : f32
    %307 = vector.broadcast %cst_114 : f32 to vector<8x128xf32>
    %308 = arith.mulf %307, %306 : vector<8x128xf32>
    %309 = math.tanh %308 : vector<8x128xf32>
    %cst_115 = arith.constant 5.000000e-01 : f32
    %310 = vector.broadcast %cst_115 : f32 to vector<8x128xf32>
    %311 = arith.mulf %310, %309 : vector<8x128xf32>
    %cst_116 = arith.constant 5.000000e-01 : f32
    %312 = vector.broadcast %cst_116 : f32 to vector<8x128xf32>
    %313 = arith.addf %311, %312 : vector<8x128xf32>
    %314 = vector.extract_strided_slice %305 {offsets = [0, 128], sizes = [8, 128], strides = [1, 1]} : vector<8x512xf32> to vector<8x128xf32>
    %cst_117 = arith.constant 5.000000e-01 : f32
    %315 = vector.broadcast %cst_117 : f32 to vector<8x128xf32>
    %316 = arith.mulf %315, %314 : vector<8x128xf32>
    %317 = math.tanh %316 : vector<8x128xf32>
    %cst_118 = arith.constant 5.000000e-01 : f32
    %318 = vector.broadcast %cst_118 : f32 to vector<8x128xf32>
    %319 = arith.mulf %318, %317 : vector<8x128xf32>
    %cst_119 = arith.constant 5.000000e-01 : f32
    %320 = vector.broadcast %cst_119 : f32 to vector<8x128xf32>
    %321 = arith.addf %319, %320 : vector<8x128xf32>
    %322 = vector.extract_strided_slice %305 {offsets = [0, 256], sizes = [8, 128], strides = [1, 1]} : vector<8x512xf32> to vector<8x128xf32>
    %323 = math.tanh %322 : vector<8x128xf32>
    %324 = vector.extract_strided_slice %305 {offsets = [0, 384], sizes = [8, 128], strides = [1, 1]} : vector<8x512xf32> to vector<8x128xf32>
    %cst_120 = arith.constant 5.000000e-01 : f32
    %325 = vector.broadcast %cst_120 : f32 to vector<8x128xf32>
    %326 = arith.mulf %325, %324 : vector<8x128xf32>
    %327 = math.tanh %326 : vector<8x128xf32>
    %cst_121 = arith.constant 5.000000e-01 : f32
    %328 = vector.broadcast %cst_121 : f32 to vector<8x128xf32>
    %329 = arith.mulf %328, %327 : vector<8x128xf32>
    %cst_122 = arith.constant 5.000000e-01 : f32
    %330 = vector.broadcast %cst_122 : f32 to vector<8x128xf32>
    %331 = arith.addf %329, %330 : vector<8x128xf32>
    %332 = arith.mulf %321, %288 : vector<8x128xf32>
    %333 = arith.mulf %313, %323 : vector<8x128xf32>
    %334 = arith.addf %332, %333 : vector<8x128xf32>
    %335 = math.tanh %334 : vector<8x128xf32>
    %336 = arith.mulf %331, %335 : vector<8x128xf32>
    %337 = vector.broadcast %297 : i32 to vector<8x1xi32>
    %338 = arith.cmpi eq, %16, %337 : vector<8x1xi32>
    %339 = vector.shape_cast %338 : vector<8x1xi1> to vector<8x1xi1>
    %340 = vector.broadcast %339 : vector<8x1xi1> to vector<8x128xi1>
    %341 = arith.select %340, %336, %295 : vector<8x128xi1>, vector<8x128xf32>
    %c7_i32_123 = arith.constant 7 : i32
    %c8_i32_124 = arith.constant 8 : i32
    %342 = arith.muli %arg0, %c8_i32_124 : i32
    %343 = arith.addi %342, %c7_i32_123 : i32
    %c8_i32_125 = arith.constant 8 : i32
    %344 = arith.muli %c7_i32_123, %c8_i32_125 : i32
    %345 = tpu.assume_multiple %344, 8 : i32
    %346 = arith.index_cast %345 : i32 to index
    %c0_126 = arith.constant 0 : index
    %347 = vector.load %arg13[%346, %c0_126] : memref<64x512xf32, #tpu.memory_space<vmem>>, vector<8x512xf32>
    %348 = arith.truncf %336 : vector<8x128xf32> to vector<8x128xbf16>
    %c0_127 = arith.constant 0 : index
    %c0_128 = arith.constant 0 : index
    %349 = vector.load %arg6[%c0_127, %c0_128] : memref<128x512xbf16, #tpu.memory_space<vmem>>, vector<128x512xbf16>
    %cst_129 = arith.constant dense<0.000000e+00> : vector<8x512xf32>
    %350 = tpu.matmul %348, %349, %cst_129 {dimension_numbers = #tpu.dot_dimension_numbers<[1], [0], [0], [1], [0, 0, 1, 1], [], []>} : vector<8x128xbf16>, vector<128x512xbf16>, vector<8x512xf32> -> vector<8x512xf32>
    %351 = arith.addf %347, %350 : vector<8x512xf32>
    %352 = vector.extract_strided_slice %351 {offsets = [0, 0], sizes = [8, 128], strides = [1, 1]} : vector<8x512xf32> to vector<8x128xf32>
    %cst_130 = arith.constant 5.000000e-01 : f32
    %353 = vector.broadcast %cst_130 : f32 to vector<8x128xf32>
    %354 = arith.mulf %353, %352 : vector<8x128xf32>
    %355 = math.tanh %354 : vector<8x128xf32>
    %cst_131 = arith.constant 5.000000e-01 : f32
    %356 = vector.broadcast %cst_131 : f32 to vector<8x128xf32>
    %357 = arith.mulf %356, %355 : vector<8x128xf32>
    %cst_132 = arith.constant 5.000000e-01 : f32
    %358 = vector.broadcast %cst_132 : f32 to vector<8x128xf32>
    %359 = arith.addf %357, %358 : vector<8x128xf32>
    %360 = vector.extract_strided_slice %351 {offsets = [0, 128], sizes = [8, 128], strides = [1, 1]} : vector<8x512xf32> to vector<8x128xf32>
    %cst_133 = arith.constant 5.000000e-01 : f32
    %361 = vector.broadcast %cst_133 : f32 to vector<8x128xf32>
    %362 = arith.mulf %361, %360 : vector<8x128xf32>
    %363 = math.tanh %362 : vector<8x128xf32>
    %cst_134 = arith.constant 5.000000e-01 : f32
    %364 = vector.broadcast %cst_134 : f32 to vector<8x128xf32>
    %365 = arith.mulf %364, %363 : vector<8x128xf32>
    %cst_135 = arith.constant 5.000000e-01 : f32
    %366 = vector.broadcast %cst_135 : f32 to vector<8x128xf32>
    %367 = arith.addf %365, %366 : vector<8x128xf32>
    %368 = vector.extract_strided_slice %351 {offsets = [0, 256], sizes = [8, 128], strides = [1, 1]} : vector<8x512xf32> to vector<8x128xf32>
    %369 = math.tanh %368 : vector<8x128xf32>
    %370 = vector.extract_strided_slice %351 {offsets = [0, 384], sizes = [8, 128], strides = [1, 1]} : vector<8x512xf32> to vector<8x128xf32>
    %cst_136 = arith.constant 5.000000e-01 : f32
    %371 = vector.broadcast %cst_136 : f32 to vector<8x128xf32>
    %372 = arith.mulf %371, %370 : vector<8x128xf32>
    %373 = math.tanh %372 : vector<8x128xf32>
    %cst_137 = arith.constant 5.000000e-01 : f32
    %374 = vector.broadcast %cst_137 : f32 to vector<8x128xf32>
    %375 = arith.mulf %374, %373 : vector<8x128xf32>
    %cst_138 = arith.constant 5.000000e-01 : f32
    %376 = vector.broadcast %cst_138 : f32 to vector<8x128xf32>
    %377 = arith.addf %375, %376 : vector<8x128xf32>
    %378 = arith.mulf %367, %334 : vector<8x128xf32>
    %379 = arith.mulf %359, %369 : vector<8x128xf32>
    %380 = arith.addf %378, %379 : vector<8x128xf32>
    %381 = math.tanh %380 : vector<8x128xf32>
    %382 = arith.mulf %377, %381 : vector<8x128xf32>
    %383 = vector.broadcast %343 : i32 to vector<8x1xi32>
    %384 = arith.cmpi eq, %16, %383 : vector<8x1xi32>
    %385 = vector.shape_cast %384 : vector<8x1xi1> to vector<8x1xi1>
    %386 = vector.broadcast %385 : vector<8x1xi1> to vector<8x128xi1>
    %387 = arith.select %386, %382, %341 : vector<8x128xi1>, vector<8x128xf32>
    %c8_i32_139 = arith.constant 8 : i32
    %c0_140 = arith.constant 0 : index
    %c0_141 = arith.constant 0 : index
    %388 = vector.load %arg14[%c0_140, %c0_141] : memref<8x128xf32, #tpu.memory_space<vmem>>, vector<8x128xf32>
    tpu.vector_store %arg14[%c0_140, %c0_141], %382 {strides = array<i32>} : memref<8x128xf32, #tpu.memory_space<vmem>>, vector<8x128xf32>,
    %c0_142 = arith.constant 0 : index
    %c0_143 = arith.constant 0 : index
    %389 = vector.load %arg15[%c0_142, %c0_143] : memref<8x128xf32, #tpu.memory_space<vmem>>, vector<8x128xf32>
    tpu.vector_store %arg15[%c0_142, %c0_143], %380 {strides = array<i32>} : memref<8x128xf32, #tpu.memory_space<vmem>>, vector<8x128xf32>,
    %c0_144 = arith.constant 0 : index
    %c0_145 = arith.constant 0 : index
    %390 = vector.load %arg16[%c0_144, %c0_145] : memref<8x128xf32, #tpu.memory_space<vmem>>, vector<8x128xf32>
    tpu.vector_store %arg16[%c0_144, %c0_145], %387 {strides = array<i32>} : memref<8x128xf32, #tpu.memory_space<vmem>>, vector<8x128xf32>,
    %c0_i32_146 = arith.constant 0 : i32
    %391 = arith.cmpi eq, %arg0, %c0_i32_146 : i32
    %392 = arith.extui %391 : i1 to i32
    %c0_i32_147 = arith.constant 0 : i32
    %393 = arith.cmpi ne, %392, %c0_i32_147 : i32
    scf.if %393 {
      %c0_148 = arith.constant 0 : index
      %c0_149 = arith.constant 0 : index
      %394 = vector.load %arg11[%c0_148, %c0_149] : memref<8x128xf32, #tpu.memory_space<vmem>>, vector<8x128xf32>
      tpu.vector_store %arg11[%c0_148, %c0_149], %382 {strides = array<i32>} : memref<8x128xf32, #tpu.memory_space<vmem>>, vector<8x128xf32>,
      %c0_150 = arith.constant 0 : index
      %c0_151 = arith.constant 0 : index
      %395 = vector.load %arg12[%c0_150, %c0_151] : memref<8x128xf32, #tpu.memory_space<vmem>>, vector<8x128xf32>
      tpu.vector_store %arg12[%c0_150, %c0_151], %380 {strides = array<i32>} : memref<8x128xf32, #tpu.memory_space<vmem>>, vector<8x128xf32>,
      %c0_152 = arith.constant 0 : index
      %c0_153 = arith.constant 0 : index
      %396 = vector.load %arg8[%c0_152, %c0_153] : memref<128x5xf32, #tpu.memory_space<vmem>>, vector<128x5xf32>
      %cst_154 = arith.constant dense<0.000000e+00> : vector<8x5xf32>
      %397 = tpu.matmul %387, %396, %cst_154 {dimension_numbers = #tpu.dot_dimension_numbers<[1], [0], [0], [1], [0, 0, 1, 1], [], []>} : vector<8x128xf32>, vector<128x5xf32>, vector<8x5xf32> -> vector<8x5xf32>
      %c0_155 = arith.constant 0 : index
      %c0_156 = arith.constant 0 : index
      %398 = vector.load %arg9[%c0_155, %c0_156] : memref<1x5xf32, #tpu.memory_space<vmem>>, vector<1x5xf32>
      %399 = vector.broadcast %398 : vector<1x5xf32> to vector<8x5xf32>
      %400 = arith.addf %397, %399 : vector<8x5xf32>
      %c0_157 = arith.constant 0 : index
      %c0_158 = arith.constant 0 : index
      %401 = vector.load %arg10[%c0_157, %c0_158] : memref<8x5xf32, #tpu.memory_space<vmem>>, vector<8x5xf32>
      tpu.vector_store %arg10[%c0_157, %c0_158], %400 {strides = array<i32>} : memref<8x5xf32, #tpu.memory_space<vmem>>, vector<8x5xf32>,
    } else {
    }
    return
  }
  func.func @transform_0(%arg0: i32) -> (i32, i32) {
    %c0_i32 = arith.constant 0 : i32
    %c0_i32_0 = arith.constant 0 : i32
    return %arg0, %c0_i32 : i32, i32
  }
  func.func @transform_1(%arg0: i32) -> (i32, i32) {
    %c0_i32 = arith.constant 0 : i32
    %c0_i32_0 = arith.constant 0 : i32
    %c0_i32_1 = arith.constant 0 : i32
    return %c0_i32, %c0_i32_0 : i32, i32
  }
  func.func @transform_2(%arg0: i32) -> (i32, i32) {
    %c0_i32 = arith.constant 0 : i32
    %c0_i32_0 = arith.constant 0 : i32
    %c0_i32_1 = arith.constant 0 : i32
    return %c0_i32, %c0_i32_0 : i32, i32
  }
  func.func @transform_3(%arg0: i32) -> (i32, i32) {
    %c0_i32 = arith.constant 0 : i32
    %c0_i32_0 = arith.constant 0 : i32
    %c0_i32_1 = arith.constant 0 : i32
    return %c0_i32, %c0_i32_0 : i32, i32
  }
  func.func @transform_4(%arg0: i32) -> (i32, i32) {
    %c0_i32 = arith.constant 0 : i32
    %c0_i32_0 = arith.constant 0 : i32
    %c0_i32_1 = arith.constant 0 : i32
    return %c0_i32, %c0_i32_0 : i32, i32
  }
  func.func @transform_5(%arg0: i32) -> (i32, i32) {
    %c0_i32 = arith.constant 0 : i32
    %c0_i32_0 = arith.constant 0 : i32
    %c0_i32_1 = arith.constant 0 : i32
    return %c0_i32, %c0_i32_0 : i32, i32
  }
  func.func @transform_6(%arg0: i32) -> (i32, i32) {
    %c0_i32 = arith.constant 0 : i32
    %c0_i32_0 = arith.constant 0 : i32
    %c0_i32_1 = arith.constant 0 : i32
    return %c0_i32, %c0_i32_0 : i32, i32
  }
  func.func @transform_7(%arg0: i32) -> (i32, i32) {
    %c0_i32 = arith.constant 0 : i32
    %c0_i32_0 = arith.constant 0 : i32
    %c0_i32_1 = arith.constant 0 : i32
    return %c0_i32, %c0_i32_0 : i32, i32
  }
  func.func @transform_8(%arg0: i32) -> (i32, i32) {
    %c0_i32 = arith.constant 0 : i32
    %c0_i32_0 = arith.constant 0 : i32
    %c0_i32_1 = arith.constant 0 : i32
    return %c0_i32, %c0_i32_0 : i32, i32
  }
  func.func @transform_9(%arg0: i32) -> (i32, i32) {
    %c0_i32 = arith.constant 0 : i32
    %c0_i32_0 = arith.constant 0 : i32
    %c0_i32_1 = arith.constant 0 : i32
    return %c0_i32, %c0_i32_0 : i32, i32
  }
  func.func @transform_10(%arg0: i32) -> (i32, i32) {
    %c0_i32 = arith.constant 0 : i32
    %c0_i32_0 = arith.constant 0 : i32
    %c0_i32_1 = arith.constant 0 : i32
    return %c0_i32, %c0_i32_0 : i32, i32
  }
  func.func @transform_11(%arg0: i32) -> (i32, i32) {
    %c0_i32 = arith.constant 0 : i32
    %c0_i32_0 = arith.constant 0 : i32
    %c0_i32_1 = arith.constant 0 : i32
    return %c0_i32, %c0_i32_0 : i32, i32
  }
}

</mosaic_0001>

<bundles_post_ra>
// kernel: tpu_custom_call.1
= control target key start
LH: loop header
LB: loop body
LE: loop exit
PB: predicated region body
PF: predicated region fallthrough
CT: control target
= control target key end

     0   :  { %17 = vsyncpa [#allocation7], 0  ;;  %s2785_s0 = inlined_call_operand.vmem [shape: bf16[64,5], index: 0, kind: input, shape index: {}]   ;;  %s2786_s1 = inlined_call_operand.vmem [shape: s32[8,1], index: 1, kind: input, shape index: {}]   ;;  %s2787_s2 = inlined_call_operand.vmem [shape: f32[8,128], index: 2, kind: input, shape index: {}]   ;;  %s2788_s3 = inlined_call_operand.vmem [shape: f32[8,128], index: 3, kind: input, shape index: {}]   ;;  %s2789_s4 = inlined_call_operand.vmem [shape: bf16[5,512], index: 4, kind: input, shape index: {}]   ;;  %s2790_s5 = inlined_call_operand.hbm [shape: bf16[128,512], index: 5, kind: input, shape index: {}]   ;;  %s2791_s6 = inlined_call_operand.vmem [shape: f32[1,512], index: 6, kind: input, shape index: {}]   ;;  %s2792_s7 = inlined_call_operand.vmem [shape: f32[128,5], index: 7, kind: input, shape index: {}]   ;;  %s2793_s8 = inlined_call_operand.vmem [shape: f32[1,5], index: 8, kind: input, shape index: {}]   ;;  %s2794_s9 = inlined_call_operand.hbm [shape: f32[8,5], index: 9, kind: output, shape index: {0}]   ;;  %s2795_s10 = inlined_call_operand.hbm [shape: f32[8,128], index: 10, kind: output, shape index: {1}]   ;;  %s2796_s11 = inlined_call_operand.hbm [shape: f32[8,128], index: 11, kind: output, shape index: {2}]  }
   0x1   :  { %18 = vsyncpa [#allocation8], 0 }
   0x2   :  { %19 = vsyncpa [#allocation11], 0  ;;  %s2018_s17 = smov [#allocation6]  }
   0x3   :  { %s35_s18 = sshll.u32 %s2018_s17, 4  ;;  %s36_s18 = int_to_ptr.vmem [resolvable:$true] %s35_s18 }
   0x4   :  { %s1940_s19 = scalar_lea.vmem %s36_s18, 4096  ;;  %p1945_p1 = scmp.lt.s32.totalorder %s36_s18, %s36_s18 }
   0x5   :  { %p1941_p0 = scmp.ne.s32.totalorder %s36_s18, %s1940_s19  ;;  %p1946_p2 = scmp.lt.s32.totalorder %s1940_s19, %s1940_s19 }
   0x7   :  { %p1947_p3 = por %p1946_p2, %p1945_p1 }
   0x9   :  { %p1948_p4 = pnand %p1947_p3, %p1941_p0 }
   0xb   :  { %1951 = shalt.err (!%p1948_p4)
}
   0xc   :  { %s2019_s20 = smov 256   ;;  %s2020_s21 = smov 16  }
   0xd   :  { %41 = dma.hbm_to_vmem [thread:$0]  %s2790_s5, 4096, %s36_s18, [#allocation7], %s2019_s20, %s2019_s20, %s2020_s21  }
   0xe   :  { %2012 = dma.done.wait [#allocation7], 4096  }
   0xf   :  { %2013 = vsyncadd [#allocation7], 4294963200  ;;  %vm136_vm0 = vcmask 1041408   ;;  %v2797_v0 = vmov 0   ;;  %vm137_vm1 = vcmask 1042432   ;;  %v2022_v1 = vmov 65535  }
  0x10   :  { %184 = vmatprep.mubr.bf16.mxu0 %v2797_v0  ;;  %257 = vmatprep.mubr.bf16.mxu1 %v2797_v0  ;;  %v138_v2 = vsel %vm136_vm0, 4294967295, %v2022_v1  ;;  %v69_v4 = vld [vmem:[%s2789_s4] sm:$0x77]  ;;  %v70_v5 = vld [vmem:[%s2789_s4 + $0x8] sm:$0x77]  ;;  %vm123_vm2 = vcmask 39936   ;;  %v73_v58 = vlaneseq }
  0x11   :  { %1762 = vset.pattern.permute.xlu0 %v2797_v0  ;;  %1763 = vset.pattern.permute.xlu1 %v2797_v0  ;;  %v139_v3 = vsel %vm137_vm1, %v138_v2, 0  ;;  %v1655_v6 = vcombine.high %v69_v4, %v69_v4  ;;  %v1657_v7 = vcombine.high %v70_v5, %v70_v5  ;;  %v1654_v8 = vcombine.low %v69_v4, %v69_v4  ;;  %v2101_v14 = vld [vmem:[#allocation6 + $0xe4] ss:$16 sps:$4 sm:$0xff]   ;;  %v2103_v15 = vld [vmem:[#allocation6 + $0xec] ss:$16 sps:$4 sm:$0xff]  }
  0x12   :  { %v1656_v9 = vcombine.low %v70_v5, %v70_v5  ;;  %v1768_v16 = vld [vmem:[%s2785_s0] sm:$0xff]   ;;  %v2110_v18 = vld [vmem:[#allocation6 + $0xe8] ss:$16 sps:$4 sm:$0xff]   ;;  %v2116_v20 = vld [vmem:[#allocation6 + $0xcc] ss:$16 sps:$4 sm:$0xff]   ;;  %v74_v59 = vshrl.u32 %v73_v58, 7 }
  0x13   :  { %v144_v10 = vand.u32 %v1655_v6, %v139_v3  ;;  %v150_v11 = vand.u32 %v1657_v7, %v139_v3  ;;  %v141_v12 = vand.u32 %v1654_v8, %v139_v3  ;;  %v2108_v17 = vld [vmem:[#allocation6 + $0xe0] ss:$16 sps:$4 sm:$0xff]   ;;  %v2112_v19 = vld [vmem:[#allocation6 + $0xc4] ss:$16 sps:$4 sm:$0xff]   ;;  %v2124_v22 = vld [vmem:[#allocation6 + $0xc8] ss:$16 sps:$4 sm:$0xff]  }
  0x14   :  { %v147_v13 = vand.u32 %v1656_v9, %v139_v3  ;;  %v2120_v21 = vld [vmem:[#allocation6 + $0xc0] ss:$16 sps:$4 sm:$0xff]   ;;  %v2126_v23 = vld [vmem:[#allocation6 + $0xa4] ss:$16 sps:$4 sm:$0xff]   ;;  %v2130_v24 = vld [vmem:[#allocation6 + $0xac] ss:$16 sps:$4 sm:$0xff]  }
  0x15   :  { %166 = vmatprep.subr.bf16.mxu0 %v144_v10  ;;  %239 = vmatprep.subr.bf16.mxu1 %v150_v11  ;;  %v1781_v25 = vld [vmem:[%s2785_s0 + $0x8] sm:$0xff]   ;;  %v2137_v26 = vld [vmem:[#allocation6 + $0xa0] ss:$16 sps:$4 sm:$0xff]   ;;  %v2143_v28 = vld [vmem:[#allocation6 + $0x84] ss:$16 sps:$4 sm:$0xff]   ;;  %v83_v60 = vsub.s32 2, %v74_v59 }
  0x16   :  { %167 = vmatpush1.bf16.msra.mxu0 %v141_v12  ;;  %240 = vmatpush1.bf16.msra.mxu1 %v147_v13  ;;  %v2139_v27 = vld [vmem:[#allocation6 + $0xa8] ss:$16 sps:$4 sm:$0xff]   ;;  %v2147_v29 = vld [vmem:[#allocation6 + $0x8c] ss:$16 sps:$4 sm:$0xff]   ;;  %v2151_v30 = vld [vmem:[#allocation6 + $0x80] ss:$16 sps:$4 sm:$0xff]  }
  0x17   :  { %540 = vmatprep.subr.bf16.mxu0 %v2101_v14  ;;  %581 = vmatprep.subr.bf16.mxu1 %v2103_v15  ;;  %v2155_v31 = vld [vmem:[#allocation6 + $0x88] ss:$16 sps:$4 sm:$0xff]   ;;  %v2159_v32 = vld [vmem:[#allocation6 + $0x64] ss:$16 sps:$4 sm:$0xff]   ;;  %v2161_v33 = vld [vmem:[#allocation6 + $0x6c] ss:$16 sps:$4 sm:$0xff]  }
  0x18   :  { %v1794_v34 = vld [vmem:[%s2785_s0 + $0x10] sm:$0xff]   ;;  %v2172_v36 = vld [vmem:[#allocation6 + $0x68] ss:$16 sps:$4 sm:$0xff]   ;;  %v2178_v38 = vld [vmem:[#allocation6 + $0x4c] ss:$16 sps:$4 sm:$0xff]   ;;  %v75_v61 = vsub.s32 0, %v74_v59 }
  0x19   :  { %1658 = vmatmul.mubr.msk.bf16.vlgmr.msra.gmra.mxu0 %vm123_vm2, %v1768_v16  ;;  %1662 = vmatmul.mubr.msk.bf16.vlgmr.msra.gmra.mxu1 %vm123_vm2, %v1768_v16  ;;  %v2168_v35 = vld [vmem:[#allocation6 + $0x60] ss:$16 sps:$4 sm:$0xff]   ;;  %v2174_v37 = vld [vmem:[#allocation6 + $0x44] ss:$16 sps:$4 sm:$0xff]   ;;  %v2186_v40 = vld [vmem:[#allocation6 + $0x48] ss:$16 sps:$4 sm:$0xff]  }
  0x1a   :  { %541 = vmatpush1.bf16.msra.mxu0 %v2108_v17  ;;  %582 = vmatpush1.bf16.msra.mxu1 %v2110_v18  ;;  %v2184_v39 = vld [vmem:[#allocation6 + $0x40] ss:$16 sps:$4 sm:$0xff]   ;;  %v2193_v42 = vld [vmem:[#allocation6 + $0x24] ss:$16 sps:$4 sm:$0xff]   ;;  %v2195_v43 = vld [vmem:[#allocation6 + $0x2c] ss:$16 sps:$4 sm:$0xff]  }
  0x1b   :  { %542 = vmatprep.subr.bf16.mxu0 %v2112_v19  ;;  %583 = vmatprep.subr.bf16.mxu1 %v2116_v20  ;;  %v330_v41 = vld [vmem:[%s2786_s1] sm:$0xff]  ;;  %v1807_v45 = vld [vmem:[%s2785_s0 + $0x18] sm:$0xff]   ;;  %v87_v62 = vsub.s32 3, %v74_v59  ;;  %v79_v4 = vsub.s32 1, %v74_v59 }
  0x1c   :  { %194 = vmatprep.mubr.bf16.mxu0 %v2797_v0  ;;  %267 = vmatprep.mubr.bf16.mxu1 %v2797_v0  ;;  %v1666_v44 = vadd.s32 4294967295, %v330_v41  ;;  %v2204_v46 = vld [vmem:[#allocation6 + $0x20] ss:$16 sps:$4 sm:$0xff]   ;;  %v2206_v47 = vld [vmem:[#allocation6 + $0x28] ss:$16 sps:$4 sm:$0xff]  }
  0x1d   :  { %v2210_v49 = vld [vmem:[#allocation6 + $0x4] ss:$16 sps:$4 sm:$0xff]   ;;  %v2212_v50 = vld [vmem:[#allocation6 + $0xc] ss:$16 sps:$4 sm:$0xff]   ;;  %v2221_v52 = vld [vmem:[#allocation6] ss:$16 sps:$4 sm:$0xff]  }
  0x1e   :  { %543 = vmatpush1.bf16.msra.mxu0 %v2120_v21  ;;  %584 = vmatpush1.bf16.msra.mxu1 %v2124_v22  ;;  %vm332_vm3 = vcmp.gt.s32.totalorder %v1666_v44, 0  ;;  %v2223_v53 = vld [vmem:[#allocation6 + $0x8] ss:$16 sps:$4 sm:$0xff]   ;;  %v56_v54 = vld [vmem:[%s2787_s2] sm:$0xff] }
  0x1f   :  { %544 = vmatprep.subr.bf16.mxu0 %v2126_v23  ;;  %585 = vmatprep.subr.bf16.mxu1 %v2130_v24  ;;  %v333_v48 = vsel %vm332_vm3, %v1666_v44, 0  ;;  %v347_v56 = vpack.c.bf16 %v56_v54, %v56_v54  ;;  %v71_v63 = vld [vmem:[%s2791_s6] sm:$0xf] }
  0x20   :  { %vm334_vm4 = vcmp.lt.s32.totalorder %v333_v48, 7  ;;  %v2280_v3 = vrot.slane %v71_v63, %v83_v60  ;;  %v76_v7 = vrot.slane %v71_v63, %v75_v61  ;;  %v2286_v8 = vrot.slane %v71_v63, %v87_v62 }
  0x21   :  { %1659 = vmatmul.mubr.msk.bf16.gmra.mxu0 %vm123_vm2, %v1781_v25  ;;  %1663 = vmatmul.mubr.msk.bf16.gmra.mxu1 %vm123_vm2, %v1781_v25  ;;  %v2214_v51 = vsel %vm334_vm4, %v333_v48, 7  ;;  %v80_v11 = vrot.slane %v71_v63, %v79_v4 }
  0x22   :  { %545 = vmatpush1.bf16.msra.mxu0 %v2137_v26  ;;  %586 = vmatpush1.bf16.msra.mxu1 %v2139_v27  ;;  %vm645_vm5 = vcmp.eq.s32.totalorder %v2214_v51, 0  ;;  %vm766_vm6 = vcmp.eq.s32.totalorder %v2214_v51, 1  ;;  %vm887_vm7 = vcmp.eq.s32.totalorder %v2214_v51, 2  ;;  %vm1008_vm10 = vcmp.eq.s32.totalorder %v2214_v51, 3 }
  0x23   :  { %546 = vmatprep.subr.bf16.mxu0 %v2143_v28  ;;  %587 = vmatprep.subr.bf16.mxu1 %v2147_v29  ;;  %v646_v55 = vsel %vm645_vm5, 1, %v2797_v0  ;;  %v767_v57 = vsel %vm766_vm6, 1, %v2797_v0  ;;  %vm1129_vm12 = vcmp.eq.s32.totalorder %v2214_v51, 4  ;;  %vm1250_vm14 = vcmp.eq.s32.totalorder %v2214_v51, 5 }
  0x24   :  { %204 = vmatprep.mubr.bf16.mxu0 %v2797_v0  ;;  %277 = vmatprep.mubr.bf16.mxu1 %v2797_v0  ;;  %vm1371_vm0 = vcmp.eq.s32.totalorder %v2214_v51, 6  ;;  %vm1492_vm3 = vcmp.eq.s32.totalorder %v2214_v51, 7  ;;  %vm2024_vm5 = vmmov 0  }
  0x25   :  { %648 = vperm.xlu0 %1762, %v646_v55  }
  0x26   :  { %547 = vmatpush1.bf16.msra.mxu0 %v2151_v30  ;;  %588 = vmatpush1.bf16.msra.mxu1 %v2155_v31 }
  0x27   :  { %548 = vmatprep.subr.bf16.mxu0 %v2159_v32  ;;  %589 = vmatprep.subr.bf16.mxu1 %v2161_v33 }
  0x29   :  { %1660 = vmatmul.mubr.msk.bf16.gmra.mxu0 %vm123_vm2, %v1794_v34  ;;  %1664 = vmatmul.mubr.msk.bf16.gmra.mxu1 %vm123_vm2, %v1794_v34 }
  0x2a   :  { %549 = vmatpush1.bf16.msra.mxu0 %v2168_v35  ;;  %590 = vmatpush1.bf16.msra.mxu1 %v2172_v36 }
  0x2b   :  { %550 = vmatprep.subr.bf16.mxu0 %v2174_v37  ;;  %591 = vmatprep.subr.bf16.mxu1 %v2178_v38 }
  0x2c   :  { %214 = vmatprep.mubr.bf16.mxu0 %v2797_v0  ;;  %287 = vmatprep.mubr.bf16.mxu1 %v2797_v0 }
  0x2d   :  { %769 = vperm.xlu0 %1762, %v767_v57  }
  0x2e   :  { %551 = vmatpush1.bf16.msra.mxu0 %v2184_v39  ;;  %592 = vmatpush1.bf16.msra.mxu1 %v2186_v40 }
  0x2f   :  { %552 = vmatprep.subr.bf16.mxu0 %v2193_v42  ;;  %593 = vmatprep.subr.bf16.mxu1 %v2195_v43 }
  0x31   :  { %1661 = vmatmul.mubr.msk.bf16.gmra.mxu0 %vm123_vm2, %v1807_v45  ;;  %1665 = vmatmul.mubr.msk.bf16.gmra.mxu1 %vm123_vm2, %v1807_v45 }
  0x32   :  { %553 = vmatpush1.bf16.msra.mxu0 %v2204_v46  ;;  %594 = vmatpush1.bf16.msra.mxu1 %v2206_v47 }
  0x33   :  { %554 = vmatprep.subr.bf16.mxu0 %v2210_v49  ;;  %595 = vmatprep.subr.bf16.mxu1 %v2212_v50 }
  0x34   :  { %572 = vmatprep.mubr.bf16.mxu0 %v2797_v0  ;;  %613 = vmatprep.mubr.bf16.mxu1 %v2797_v0 }
  0x36   :  { %555 = vmatpush1.bf16.msra.mxu0 %v2221_v52  ;;  %596 = vmatpush1.bf16.msra.mxu1 %v2223_v53 }
  0x37   :  { %661 = vmatprep.subr.bf16.mxu0 %v2101_v14  ;;  %702 = vmatprep.subr.bf16.mxu1 %v2103_v15 }
  0x39   :  { %573 = vmatmul.mubr.bf16.vlgmr.msra.gmra.mxu0 %v347_v56  ;;  %614 = vmatmul.mubr.bf16.vlgmr.msra.gmra.mxu1 %v347_v56 }
  0x3a   :  { %662 = vmatpush1.bf16.msra.mxu0 %v2108_v17  ;;  %703 = vmatpush1.bf16.msra.mxu1 %v2110_v18 }
  0x3b   :  { %663 = vmatprep.subr.bf16.mxu0 %v2112_v19  ;;  %704 = vmatprep.subr.bf16.mxu1 %v2116_v20 }
  0x3c   :  { %693 = vmatprep.mubr.bf16.mxu0 %v2797_v0  ;;  %734 = vmatprep.mubr.bf16.mxu1 %v2797_v0 }
  0x3e   :  { %664 = vmatpush1.bf16.msra.mxu0 %v2120_v21  ;;  %705 = vmatpush1.bf16.msra.mxu1 %v2124_v22 }
  0x3f   :  { %665 = vmatprep.subr.bf16.mxu0 %v2126_v23  ;;  %706 = vmatprep.subr.bf16.mxu1 %v2130_v24 }
  0x42   :  { %666 = vmatpush1.bf16.msra.mxu0 %v2137_v26  ;;  %707 = vmatpush1.bf16.msra.mxu1 %v2139_v27 }
  0x43   :  { %667 = vmatprep.subr.bf16.mxu0 %v2143_v28  ;;  %708 = vmatprep.subr.bf16.mxu1 %v2147_v29 }
  0x46   :  { %668 = vmatpush1.bf16.msra.mxu0 %v2151_v30  ;;  %709 = vmatpush1.bf16.msra.mxu1 %v2155_v31 }
  0x47   :  { %669 = vmatprep.subr.bf16.mxu0 %v2159_v32  ;;  %710 = vmatprep.subr.bf16.mxu1 %v2161_v33 }
  0x4a   :  { %670 = vmatpush1.bf16.msra.mxu0 %v2168_v35  ;;  %711 = vmatpush1.bf16.msra.mxu1 %v2172_v36 }
  0x4b   :  { %671 = vmatprep.subr.bf16.mxu0 %v2174_v37  ;;  %712 = vmatprep.subr.bf16.mxu1 %v2178_v38 }
  0x4e   :  { %672 = vmatpush1.bf16.msra.mxu0 %v2184_v39  ;;  %713 = vmatpush1.bf16.msra.mxu1 %v2186_v40 }
  0x4f   :  { %673 = vmatprep.subr.bf16.mxu0 %v2193_v42  ;;  %714 = vmatprep.subr.bf16.mxu1 %v2195_v43 }
  0x52   :  { %674 = vmatpush1.bf16.msra.mxu0 %v2204_v46  ;;  %715 = vmatpush1.bf16.msra.mxu1 %v2206_v47 }
  0x53   :  { %675 = vmatprep.subr.bf16.mxu0 %v2210_v49  ;;  %716 = vmatprep.subr.bf16.mxu1 %v2212_v50 }
  0x56   :  { %676 = vmatpush1.bf16.msra.mxu0 %v2221_v52  ;;  %717 = vmatpush1.bf16.msra.mxu1 %v2223_v53 }
  0x57   :  { %782 = vmatprep.subr.bf16.mxu0 %v2101_v14  ;;  %823 = vmatprep.subr.bf16.mxu1 %v2103_v15 }
  0xd9   :  { %v2276_v1 = vpop.f32.mrf.mxu0  ;;  %v2278_v2 = vpop.f32.mrf.mxu1 }
  0xdb   :  { %v2282_v5 = vpop.f32.mrf.mxu0  ;;  %v2284_v6 = vpop.f32.mrf.mxu1 }
  0xdd   :  { %v190_v9 = vpop.f32.mrf.mxu0  ;;  %v263_v10 = vpop.f32.mrf.mxu1 }
  0xde   :  { %v2288_v12 = vadd.f32 %v190_v9, %v76_v7  ;;  %v2291_v13 = vadd.f32 %v263_v10, %v2280_v3 }
  0xdf   :  { %v192_v16 = vpop.f32.mrf.mxu0  ;;  %v265_v25 = vpop.f32.mrf.mxu1 }
  0xe0   :  { %v2293_v34 = vadd.f32 %v192_v16, %v80_v11  ;;  %v2296_v41 = vadd.f32 %v265_v25, %v2286_v8 }
  0xe1   :  { %v196_v44 = vpop.f32.mrf.mxu0  ;;  %v269_v45 = vpop.f32.mrf.mxu1 }
  0xe2   :  { %v2298_v48 = vadd.f32 %v196_v44, %v76_v7  ;;  %v2301_v54 = vadd.f32 %v269_v45, %v2280_v3 }
  0xe3   :  { %v198_v55 = vpop.f32.mrf.mxu0  ;;  %v271_v56 = vpop.f32.mrf.mxu1 }
  0xe4   :  { %v2303_v57 = vadd.f32 %v198_v55, %v80_v11  ;;  %v2306_v58 = vadd.f32 %v271_v56, %v2286_v8 }
  0xe5   :  { %v200_v59 = vpop.f32.mrf.mxu0  ;;  %v273_v60 = vpop.f32.mrf.mxu1 }
  0xe6   :  { %2799 = vst [vmem:[#allocation16_spill] sm:$0xff] %v2306_v58  ;;  %v2308_v61 = vadd.f32 %v200_v59, %v76_v7  ;;  %v2311_v62 = vadd.f32 %v273_v60, %v2280_v3  ;;  %v260_v58 = vadd.f32 %v2278_v2, %v2280_v3  ;;  %v58_v2 = vld [vmem:[%s2788_s3] sm:$0xff] }
  0xe7   :  { %v202_v63 = vpop.f32.mrf.mxu0  ;;  %v275_v4 = vpop.f32.mrf.mxu1 }
  0xe8   :  { %2800 = vst [vmem:[#allocation17_spill] sm:$0xff] %v2308_v61  ;;  %2801 = vst [vmem:[#allocation18_spill] sm:$0xff] %v2311_v62  ;;  %v2313_v9 = vadd.f32 %v202_v63, %v80_v11  ;;  %v2316_v10 = vadd.f32 %v275_v4, %v2286_v8 }
  0xe9   :  { %v206_v16 = vpop.f32.mrf.mxu0  ;;  %v279_v25 = vpop.f32.mrf.mxu1 }
  0xea   :  { %2802 = vst [vmem:[#allocation19_spill] sm:$0xff] %v2313_v9  ;;  %2803 = vst [vmem:[#allocation20_spill] sm:$0xff] %v2316_v10  ;;  %v2318_v44 = vadd.f32 %v206_v16, %v76_v7  ;;  %v2321_v45 = vadd.f32 %v279_v25, %v2280_v3 }
  0xeb   :  { %v208_v55 = vpop.f32.mrf.mxu0  ;;  %v281_v56 = vpop.f32.mrf.mxu1 }
  0xec   :  { %2804 = vst [vmem:[#allocation21_spill] sm:$0xff] %v2318_v44  ;;  %2805 = vst [vmem:[#allocation22_spill] sm:$0xff] %v2321_v45  ;;  %v2323_v59 = vadd.f32 %v208_v55, %v80_v11  ;;  %v2326_v60 = vadd.f32 %v281_v56, %v2286_v8 }
  0xed   :  { %v210_v0 = vpop.f32.mrf.mxu0  ;;  %v283_v63 = vpop.f32.mrf.mxu1 }
  0xee   :  { %2806 = vst [vmem:[#allocation23_spill] sm:$0xff] %v2323_v59  ;;  %2807 = vst [vmem:[#allocation24_spill] sm:$0xff] %v2326_v60  ;;  %v2328_v62 = vadd.f32 %v210_v0, %v76_v7  ;;  %v2331_v4 = vadd.f32 %v283_v63, %v2280_v3 }
  0xef   :  { %v212_v10 = vpop.f32.mrf.mxu0  ;;  %v285_v16 = vpop.f32.mrf.mxu1 }
  0xf0   :  { %2808 = vst [vmem:[#allocation25_spill] sm:$0xff] %v2328_v62  ;;  %2809 = vst [vmem:[#allocation26_spill] sm:$0xff] %v2331_v4  ;;  %v2333_v44 = vadd.f32 %v212_v10, %v80_v11  ;;  %v2336_v25 = vadd.f32 %v285_v16, %v2286_v8 }
  0xf1   :  { %v216_v45 = vpop.f32.mrf.mxu0  ;;  %v289_v55 = vpop.f32.mrf.mxu1 }
  0xf2   :  { %2810 = vst [vmem:[#allocation27_spill] sm:$0xff] %v2333_v44  ;;  %2811 = vst [vmem:[#allocation28_spill] sm:$0xff] %v2336_v25  ;;  %v2338_v59 = vadd.f32 %v216_v45, %v76_v7  ;;  %v2341_v56 = vadd.f32 %v289_v55, %v2280_v3 }
  0xf3   :  { %v218_v60 = vpop.f32.mrf.mxu0  ;;  %v291_v0 = vpop.f32.mrf.mxu1 }
  0xf4   :  { %2812 = vst [vmem:[#allocation29_spill] sm:$0xff] %v2338_v59  ;;  %2813 = vst [vmem:[#allocation30_spill] sm:$0xff] %v2341_v56  ;;  %v2343_v62 = vadd.f32 %v218_v60, %v80_v11  ;;  %v2346_v63 = vadd.f32 %v291_v0, %v2286_v8  ;;  %v187_v59 = vadd.f32 %v2276_v1, %v76_v7 }
  0xf5   :  { %v220_v4 = vpop.f32.mrf.mxu0  ;;  %v293_v10 = vpop.f32.mrf.mxu1  ;;  %v189_v0 = vadd.f32 %v2282_v5, %v80_v11 }
  0xf6   :  { %2814 = vst [vmem:[#allocation31_spill] sm:$0xff] %v2343_v62  ;;  %2815 = vst [vmem:[#allocation32_spill] sm:$0xff] %v2346_v63  ;;  %v2348_v44 = vadd.f32 %v220_v4, %v76_v7  ;;  %v2351_v16 = vadd.f32 %v293_v10, %v2280_v3 }
  0xf7   :  { %v222_v25 = vpop.f32.mrf.mxu0  ;;  %v295_v45 = vpop.f32.mrf.mxu1 }
  0xf8   :  { %2816 = vst [vmem:[#allocation33_spill] sm:$0xff] %v2348_v44  ;;  %2817 = vst [vmem:[#allocation34_spill] sm:$0xff] %v2351_v16  ;;  %v2354_v55 = vadd.f32 %v222_v25, %v80_v11  ;;  %v2357_v56 = vadd.f32 %v295_v45, %v2286_v8 }
  0xf9   :  { %v574_v60 = vpop.f32.mrf.mxu0  ;;  %v615_v62 = vpop.f32.mrf.mxu1 }
  0xfa   :  { %2818 = vst [vmem:[#allocation35_spill] sm:$0xff] %v2357_v56  ;;  %v622_v63 = vadd.f32 %v574_v60, %v187_v59  ;;  %v624_v45 = vadd.f32 %v615_v62, %v260_v58  ;;  %v262_v56 = vadd.f32 %v2284_v6, %v2286_v8 }
  0xfb   :  { %v576_v9 = vpop.f32.mrf.mxu0  ;;  %v617_v4 = vpop.f32.mrf.mxu1 }
  0xfc   :  { %v626_v44 = vmul.f32 0.5, %v622_v63  ;;  %v623_v61 = vadd.f32 %v576_v9, %v189_v0  ;;  %v625_v5 = vadd.f32 %v617_v4, %v262_v56 }
  0xfd   :  { %v578_v10 = vpop.f32.mrf.mxu0  ;;  %v619_v16 = vpop.f32.mrf.mxu1 }
  0xfe   :  { %1820 = vtanh.f32 %v626_v44  ;;  %v630_v1 = vmul.f32 0.5, %v623_v61  ;;  %v635_v11 = vmul.f32 0.5, %v625_v5 }
  0xff   :  { %v579_v7 = vpop.f32.mrf.mxu0  ;;  %v620_v25 = vpop.f32.mrf.mxu1 }
 0x100   :  { %1822 = vtanh.f32 %v630_v1  ;;  %v2819_v1 = vmov 0  }
 0x101   :  { %1824 = vtanh.f32 %v624_v45  ;;  %v888_v7 = vsel %vm887_vm7, 1, %v2819_v1 }
 0x102   :  { %1826 = vtanh.f32 %v635_v11  ;;  %890 = vperm.xlu1 %1763, %v888_v7  }
 0x10b   :  { %v1821_v59 = vpop.eup %1820 }
 0x10c   :  { %v628_v63 = vmul.f32 0.5, %v1821_v59 }
 0x10d   :  { %v1823_v9 = vpop.eup %1822 }
 0x10e   :  { %v629_v60 = vadd.f32 0.5, %v628_v63  ;;  %v632_v16 = vmul.f32 0.5, %v1823_v9  ;;  %v1825_v61 = vpop.eup %1824 }
 0x10f   :  { %v1827_v6 = vpop.eup %1826 }
 0x110   :  { %v633_v3 = vadd.f32 0.5, %v632_v16  ;;  %v640_v62 = vmul.f32 %v1825_v61, %v629_v60  ;;  %v637_v8 = vmul.f32 0.5, %v1827_v6 }
 0x112   :  { %v639_v58 = vmul.f32 %v633_v3, %v58_v2  ;;  %v638_v56 = vadd.f32 0.5, %v637_v8 }
 0x114   :  { %v2367_v44 = vadd.f32 %v640_v62, %v639_v58 }
 0x116   :  { %1828 = vtanh.f32 %v2367_v44 }
 0x123   :  { %v1829_v0 = vpop.eup %1828 }
 0x124   :  { %v2370_v4 = vmul.f32 %v1829_v0, %v638_v56 }
 0x126   :  { %v660_v10 = vpack.c.bf16 %v2370_v4, %v2370_v4 }
 0x128   :  { %694 = vmatmul.mubr.bf16.vlgmr.msra.gmra.mxu0 %v660_v10  ;;  %735 = vmatmul.mubr.bf16.vlgmr.msra.gmra.mxu1 %v660_v10 }
 0x129   :  { %783 = vmatpush1.bf16.msra.mxu0 %v2108_v17  ;;  %824 = vmatpush1.bf16.msra.mxu1 %v2110_v18 }
 0x12a   :  { %784 = vmatprep.subr.bf16.mxu0 %v2112_v19  ;;  %825 = vmatprep.subr.bf16.mxu1 %v2116_v20 }
 0x12b   :  { %814 = vmatprep.mubr.bf16.mxu0 %v2819_v1  ;;  %855 = vmatprep.mubr.bf16.mxu1 %v2819_v1 }
 0x12d   :  { %785 = vmatpush1.bf16.msra.mxu0 %v2120_v21  ;;  %826 = vmatpush1.bf16.msra.mxu1 %v2124_v22 }
 0x12e   :  { %786 = vmatprep.subr.bf16.mxu0 %v2126_v23  ;;  %827 = vmatprep.subr.bf16.mxu1 %v2130_v24 }
 0x131   :  { %787 = vmatpush1.bf16.msra.mxu0 %v2137_v26  ;;  %828 = vmatpush1.bf16.msra.mxu1 %v2139_v27 }
 0x132   :  { %788 = vmatprep.subr.bf16.mxu0 %v2143_v28  ;;  %829 = vmatprep.subr.bf16.mxu1 %v2147_v29 }
 0x135   :  { %789 = vmatpush1.bf16.msra.mxu0 %v2151_v30  ;;  %830 = vmatpush1.bf16.msra.mxu1 %v2155_v31 }
 0x136   :  { %790 = vmatprep.subr.bf16.mxu0 %v2159_v32  ;;  %831 = vmatprep.subr.bf16.mxu1 %v2161_v33 }
 0x139   :  { %791 = vmatpush1.bf16.msra.mxu0 %v2168_v35  ;;  %832 = vmatpush1.bf16.msra.mxu1 %v2172_v36 }
 0x13a   :  { %792 = vmatprep.subr.bf16.mxu0 %v2174_v37  ;;  %833 = vmatprep.subr.bf16.mxu1 %v2178_v38 }
 0x13d   :  { %793 = vmatpush1.bf16.msra.mxu0 %v2184_v39  ;;  %834 = vmatpush1.bf16.msra.mxu1 %v2186_v40 }
 0x13e   :  { %794 = vmatprep.subr.bf16.mxu0 %v2193_v42  ;;  %835 = vmatprep.subr.bf16.mxu1 %v2195_v43 }
 0x141   :  { %795 = vmatpush1.bf16.msra.mxu0 %v2204_v46  ;;  %836 = vmatpush1.bf16.msra.mxu1 %v2206_v47 }
 0x142   :  { %796 = vmatprep.subr.bf16.mxu0 %v2210_v49  ;;  %837 = vmatprep.subr.bf16.mxu1 %v2212_v50 }
 0x145   :  { %797 = vmatpush1.bf16.msra.mxu0 %v2221_v52  ;;  %838 = vmatpush1.bf16.msra.mxu1 %v2223_v53 }
 0x146   :  { %903 = vmatprep.subr.bf16.mxu0 %v2101_v14  ;;  %944 = vmatprep.subr.bf16.mxu1 %v2103_v15 }
 0x1e8   :  { %v695_v25 = vpop.f32.mrf.mxu0  ;;  %v736_v45 = vpop.f32.mrf.mxu1 }
 0x1e9   :  { %v743_v5 = vadd.f32 %v695_v25, %v2288_v12  ;;  %v745_v2 = vadd.f32 %v736_v45, %v2291_v13 }
 0x1ea   :  { %v697_v11 = vpop.f32.mrf.mxu0  ;;  %v738_v59 = vpop.f32.mrf.mxu1 }
 0x1eb   :  { %v747_v63 = vmul.f32 0.5, %v743_v5  ;;  %v744_v9 = vadd.f32 %v697_v11, %v2293_v34  ;;  %v746_v62 = vadd.f32 %v738_v59, %v2296_v41  ;;  %v649_v11 = vpop.permute.xlu0 %648 }
 0x1ec   :  { %v699_v60 = vpop.f32.mrf.mxu0  ;;  %v740_v16 = vpop.f32.mrf.mxu1  ;;  %vm650_vm8 = vcmp.eq.s32.totalorder %v649_v11, 1 }
 0x1ed   :  { %1830 = vtanh.f32 %v747_v63  ;;  %v751_v3 = vmul.f32 0.5, %v744_v9  ;;  %v756_v6 = vmul.f32 0.5, %v746_v62  ;;  %v651_v16 = vsel %vm650_vm8, %v2370_v4, 0.0 }
 0x1ee   :  { %v700_v61 = vpop.f32.mrf.mxu0  ;;  %v741_v58 = vpop.f32.mrf.mxu1 }
 0x1ef   :  { %1832 = vtanh.f32 %v751_v3  ;;  %v770_v41 = vpop.permute.xlu0 %769 }
 0x1f0   :  { %1834 = vtanh.f32 %v745_v2  ;;  %vm771_vm9 = vcmp.eq.s32.totalorder %v770_v41, 1 }
 0x1f1   :  { %1836 = vtanh.f32 %v756_v6 }
 0x1fa   :  { %v1831_v8 = vpop.eup %1830 }
 0x1fb   :  { %v749_v12 = vmul.f32 0.5, %v1831_v8 }
 0x1fc   :  { %v1833_v56 = vpop.eup %1832 }
 0x1fd   :  { %v750_v0 = vadd.f32 0.5, %v749_v12  ;;  %v753_v10 = vmul.f32 0.5, %v1833_v56  ;;  %v1835_v34 = vpop.eup %1834 }
 0x1fe   :  { %v1837_v45 = vpop.eup %1836 }
 0x1ff   :  { %v754_v7 = vadd.f32 0.5, %v753_v10  ;;  %v761_v25 = vmul.f32 %v1835_v34, %v750_v0  ;;  %v758_v63 = vmul.f32 0.5, %v1837_v45 }
 0x201   :  { %v760_v5 = vmul.f32 %v754_v7, %v2367_v44  ;;  %v759_v59 = vadd.f32 0.5, %v758_v63  ;;  %v1009_v44 = vsel %vm1008_vm10, 1, %v2819_v1 }
 0x202   :  { %1011 = vperm.xlu1 %1763, %v1009_v44  }
 0x203   :  { %v2415_v13 = vadd.f32 %v761_v25, %v760_v5  ;;  %v2820_v5 = vld [vmem:[#allocation16_spill] sm:$0xff] }
 0x205   :  { %1838 = vtanh.f32 %v2415_v13 }
 0x212   :  { %v1839_v9 = vpop.eup %1838 }
 0x213   :  { %v764_v60 = vmul.f32 %v1839_v9, %v759_v59 }
 0x215   :  { %v2419_v2 = vsel %vm771_vm9, %v764_v60, %v651_v16  ;;  %v781_v3 = vpack.c.bf16 %v764_v60, %v764_v60 }
 0x217   :  { %815 = vmatmul.mubr.bf16.vlgmr.msra.gmra.mxu0 %v781_v3  ;;  %856 = vmatmul.mubr.bf16.vlgmr.msra.gmra.mxu1 %v781_v3 }
 0x218   :  { %904 = vmatpush1.bf16.msra.mxu0 %v2108_v17  ;;  %945 = vmatpush1.bf16.msra.mxu1 %v2110_v18 }
 0x219   :  { %905 = vmatprep.subr.bf16.mxu0 %v2112_v19  ;;  %946 = vmatprep.subr.bf16.mxu1 %v2116_v20 }
 0x21a   :  { %935 = vmatprep.mubr.bf16.mxu0 %v2819_v1  ;;  %976 = vmatprep.mubr.bf16.mxu1 %v2819_v1 }
 0x21c   :  { %906 = vmatpush1.bf16.msra.mxu0 %v2120_v21  ;;  %947 = vmatpush1.bf16.msra.mxu1 %v2124_v22 }
 0x21d   :  { %907 = vmatprep.subr.bf16.mxu0 %v2126_v23  ;;  %948 = vmatprep.subr.bf16.mxu1 %v2130_v24 }
 0x220   :  { %908 = vmatpush1.bf16.msra.mxu0 %v2137_v26  ;;  %949 = vmatpush1.bf16.msra.mxu1 %v2139_v27 }
 0x221   :  { %909 = vmatprep.subr.bf16.mxu0 %v2143_v28  ;;  %950 = vmatprep.subr.bf16.mxu1 %v2147_v29 }
 0x224   :  { %910 = vmatpush1.bf16.msra.mxu0 %v2151_v30  ;;  %951 = vmatpush1.bf16.msra.mxu1 %v2155_v31 }
 0x225   :  { %911 = vmatprep.subr.bf16.mxu0 %v2159_v32  ;;  %952 = vmatprep.subr.bf16.mxu1 %v2161_v33 }
 0x228   :  { %912 = vmatpush1.bf16.msra.mxu0 %v2168_v35  ;;  %953 = vmatpush1.bf16.msra.mxu1 %v2172_v36 }
 0x229   :  { %913 = vmatprep.subr.bf16.mxu0 %v2174_v37  ;;  %954 = vmatprep.subr.bf16.mxu1 %v2178_v38 }
 0x22c   :  { %914 = vmatpush1.bf16.msra.mxu0 %v2184_v39  ;;  %955 = vmatpush1.bf16.msra.mxu1 %v2186_v40 }
 0x22d   :  { %915 = vmatprep.subr.bf16.mxu0 %v2193_v42  ;;  %956 = vmatprep.subr.bf16.mxu1 %v2195_v43 }
 0x230   :  { %916 = vmatpush1.bf16.msra.mxu0 %v2204_v46  ;;  %957 = vmatpush1.bf16.msra.mxu1 %v2206_v47 }
 0x231   :  { %917 = vmatprep.subr.bf16.mxu0 %v2210_v49  ;;  %958 = vmatprep.subr.bf16.mxu1 %v2212_v50 }
 0x234   :  { %918 = vmatpush1.bf16.msra.mxu0 %v2221_v52  ;;  %959 = vmatpush1.bf16.msra.mxu1 %v2223_v53 }
 0x235   :  { %1024 = vmatprep.subr.bf16.mxu0 %v2101_v14  ;;  %1065 = vmatprep.subr.bf16.mxu1 %v2103_v15 }
 0x2d7   :  { %v816_v4 = vpop.f32.mrf.mxu0  ;;  %v857_v61 = vpop.f32.mrf.mxu1 }
 0x2d8   :  { %v864_v58 = vadd.f32 %v816_v4, %v2298_v48  ;;  %v866_v10 = vadd.f32 %v857_v61, %v2301_v54  ;;  %v891_v61 = vpop.permute.xlu1 %890 }
 0x2d9   :  { %v818_v62 = vpop.f32.mrf.mxu0  ;;  %v859_v6 = vpop.f32.mrf.mxu1  ;;  %vm892_vm11 = vcmp.eq.s32.totalorder %v891_v61, 1 }
 0x2da   :  { %v868_v8 = vmul.f32 0.5, %v864_v58  ;;  %v865_v12 = vadd.f32 %v818_v62, %v2303_v57  ;;  %v867_v45 = vadd.f32 %v859_v6, %v2820_v5 }
 0x2db   :  { %v820_v56 = vpop.f32.mrf.mxu0  ;;  %v861_v0 = vpop.f32.mrf.mxu1 }
 0x2dc   :  { %1840 = vtanh.f32 %v868_v8  ;;  %v872_v34 = vmul.f32 0.5, %v865_v12  ;;  %v877_v11 = vmul.f32 0.5, %v867_v45 }
 0x2dd   :  { %v821_v7 = vpop.f32.mrf.mxu0  ;;  %v862_v25 = vpop.f32.mrf.mxu1 }
 0x2de   :  { %1842 = vtanh.f32 %v872_v34 }
 0x2df   :  { %1844 = vtanh.f32 %v866_v10  ;;  %v2822_v10 = vld [vmem:[#allocation19_spill] sm:$0xff] }
 0x2e0   :  { %1846 = vtanh.f32 %v877_v11 }
 0x2e9   :  { %v1841_v63 = vpop.eup %1840 }
 0x2ea   :  { %v870_v48 = vmul.f32 0.5, %v1841_v63  ;;  %v2824_v63 = vld [vmem:[#allocation20_spill] sm:$0xff] }
 0x2eb   :  { %v1843_v41 = vpop.eup %1842 }
 0x2ec   :  { %v871_v59 = vadd.f32 0.5, %v870_v48  ;;  %v874_v9 = vmul.f32 0.5, %v1843_v41  ;;  %v1845_v57 = vpop.eup %1844 }
 0x2ed   :  { %v1847_v44 = vpop.eup %1846 }
 0x2ee   :  { %v875_v60 = vadd.f32 0.5, %v874_v9  ;;  %v882_v16 = vmul.f32 %v1845_v57, %v871_v59  ;;  %v879_v4 = vmul.f32 0.5, %v1847_v44 }
 0x2f0   :  { %v881_v3 = vmul.f32 %v875_v60, %v2415_v13  ;;  %v880_v58 = vadd.f32 0.5, %v879_v4 }
 0x2f2   :  { %v2462_v54 = vadd.f32 %v882_v16, %v881_v3 }
 0x2f4   :  { %1848 = vtanh.f32 %v2462_v54 }
 0x301   :  { %v1849_v62 = vpop.eup %1848 }
 0x302   :  { %v885_v6 = vmul.f32 %v1849_v62, %v880_v58 }
 0x304   :  { %v2466_v8 = vsel %vm892_vm11, %v885_v6, %v2419_v2  ;;  %v902_v12 = vpack.c.bf16 %v885_v6, %v885_v6 }
 0x306   :  { %936 = vmatmul.mubr.bf16.vlgmr.msra.gmra.mxu0 %v902_v12  ;;  %977 = vmatmul.mubr.bf16.vlgmr.msra.gmra.mxu1 %v902_v12  ;;  %v1012_v12 = vpop.permute.xlu1 %1011 }
 0x307   :  { %1025 = vmatpush1.bf16.msra.mxu0 %v2108_v17  ;;  %1066 = vmatpush1.bf16.msra.mxu1 %v2110_v18  ;;  %v1130_v17 = vsel %vm1129_vm12, 1, %v2819_v1  ;;  %vm1013_vm13 = vcmp.eq.s32.totalorder %v1012_v12, 1  ;;  %v2613_v12 = vld [vmem:[#allocation6 + $0x6c] ss:$16 sps:$4 sm:$0xff]  }
 0x308   :  { %1026 = vmatprep.subr.bf16.mxu0 %v2112_v19  ;;  %1067 = vmatprep.subr.bf16.mxu1 %v2116_v20  ;;  %v2821_v20 = vld [vmem:[#allocation17_spill] sm:$0xff] }
 0x309   :  { %1056 = vmatprep.mubr.bf16.mxu0 %v2819_v1  ;;  %1097 = vmatprep.mubr.bf16.mxu1 %v2819_v1 }
 0x30a   :  { %1132 = vperm.xlu0 %1762, %v1130_v17  }
 0x30b   :  { %1027 = vmatpush1.bf16.msra.mxu0 %v2120_v21  ;;  %1068 = vmatpush1.bf16.msra.mxu1 %v2124_v22 }
 0x30c   :  { %1028 = vmatprep.subr.bf16.mxu0 %v2126_v23  ;;  %1069 = vmatprep.subr.bf16.mxu1 %v2130_v24 }
 0x30f   :  { %1029 = vmatpush1.bf16.msra.mxu0 %v2137_v26  ;;  %1070 = vmatpush1.bf16.msra.mxu1 %v2139_v27 }
 0x310   :  { %1030 = vmatprep.subr.bf16.mxu0 %v2143_v28  ;;  %1071 = vmatprep.subr.bf16.mxu1 %v2147_v29 }
 0x313   :  { %1031 = vmatpush1.bf16.msra.mxu0 %v2151_v30  ;;  %1072 = vmatpush1.bf16.msra.mxu1 %v2155_v31 }
 0x314   :  { %1032 = vmatprep.subr.bf16.mxu0 %v2159_v32  ;;  %1073 = vmatprep.subr.bf16.mxu1 %v2161_v33 }
 0x317   :  { %1033 = vmatpush1.bf16.msra.mxu0 %v2168_v35  ;;  %1074 = vmatpush1.bf16.msra.mxu1 %v2172_v36 }
 0x318   :  { %1034 = vmatprep.subr.bf16.mxu0 %v2174_v37  ;;  %1075 = vmatprep.subr.bf16.mxu1 %v2178_v38 }
 0x31b   :  { %1035 = vmatpush1.bf16.msra.mxu0 %v2184_v39  ;;  %1076 = vmatpush1.bf16.msra.mxu1 %v2186_v40 }
 0x31c   :  { %1036 = vmatprep.subr.bf16.mxu0 %v2193_v42  ;;  %1077 = vmatprep.subr.bf16.mxu1 %v2195_v43 }
 0x31f   :  { %1037 = vmatpush1.bf16.msra.mxu0 %v2204_v46  ;;  %1078 = vmatpush1.bf16.msra.mxu1 %v2206_v47 }
 0x320   :  { %1038 = vmatprep.subr.bf16.mxu0 %v2210_v49  ;;  %1079 = vmatprep.subr.bf16.mxu1 %v2212_v50 }
 0x323   :  { %1039 = vmatpush1.bf16.msra.mxu0 %v2221_v52  ;;  %1080 = vmatpush1.bf16.msra.mxu1 %v2223_v53 }
 0x324   :  { %1145 = vmatprep.subr.bf16.mxu0 %v2101_v14  ;;  %1186 = vmatprep.subr.bf16.mxu1 %v2103_v15  ;;  %v2823_v14 = vld [vmem:[#allocation18_spill] sm:$0xff] }
 0x3c6   :  { %v937_v18 = vpop.f32.mrf.mxu0  ;;  %v978_v19 = vpop.f32.mrf.mxu1 }
 0x3c7   :  { %v985_v13 = vadd.f32 %v937_v18, %v2821_v20  ;;  %v987_v5 = vadd.f32 %v978_v19, %v2823_v14 }
 0x3c8   :  { %v939_v2 = vpop.f32.mrf.mxu0  ;;  %v980_v56 = vpop.f32.mrf.mxu1 }
 0x3c9   :  { %v989_v0 = vmul.f32 0.5, %v985_v13  ;;  %v986_v34 = vadd.f32 %v939_v2, %v2822_v10  ;;  %v988_v48 = vadd.f32 %v980_v56, %v2824_v63  ;;  %v2515_v2 = vld [vmem:[#allocation6 + $0xe0] ss:$16 sps:$4 sm:$0xff]   ;;  %v2521_v56 = vld [vmem:[#allocation6 + $0xc4] ss:$16 sps:$4 sm:$0xff]  }
 0x3ca   :  { %v941_v7 = vpop.f32.mrf.mxu0  ;;  %v982_v25 = vpop.f32.mrf.mxu1 }
 0x3cb   :  { %1850 = vtanh.f32 %v989_v0  ;;  %v993_v15 = vmul.f32 0.5, %v986_v34  ;;  %v998_v41 = vmul.f32 0.5, %v988_v48  ;;  %v2524_v0 = vld [vmem:[#allocation6 + $0xcc] ss:$16 sps:$4 sm:$0xff]  }
 0x3cc   :  { %v942_v45 = vpop.f32.mrf.mxu0  ;;  %v983_v11 = vpop.f32.mrf.mxu1 }
 0x3cd   :  { %1852 = vtanh.f32 %v993_v15  ;;  %v1133_v45 = vpop.permute.xlu0 %1132 }
 0x3ce   :  { %1854 = vtanh.f32 %v987_v5  ;;  %vm1134_vm15 = vcmp.eq.s32.totalorder %v1133_v45, 1 }
 0x3cf   :  { %1856 = vtanh.f32 %v998_v41 }
 0x3d8   :  { %v1851_v59 = vpop.eup %1850 }
 0x3d9   :  { %v991_v9 = vmul.f32 0.5, %v1851_v59 }
 0x3da   :  { %v1853_v57 = vpop.eup %1852 }
 0x3db   :  { %v992_v60 = vadd.f32 0.5, %v991_v9  ;;  %v995_v16 = vmul.f32 0.5, %v1853_v57  ;;  %v1855_v3 = vpop.eup %1854  ;;  %v2580_v9 = vld [vmem:[#allocation6 + $0xc0] ss:$16 sps:$4 sm:$0xff]   ;;  %v2583_v57 = vld [vmem:[#allocation6 + $0xc8] ss:$16 sps:$4 sm:$0xff]  }
 0x3dc   :  { %v1857_v62 = vpop.eup %1856 }
 0x3dd   :  { %v996_v44 = vadd.f32 0.5, %v995_v16  ;;  %v1003_v4 = vmul.f32 %v1855_v3, %v992_v60  ;;  %v1000_v6 = vmul.f32 0.5, %v1857_v62  ;;  %v2586_v60 = vld [vmem:[#allocation6 + $0xa4] ss:$16 sps:$4 sm:$0xff]   ;;  %v2589_v16 = vld [vmem:[#allocation6 + $0xac] ss:$16 sps:$4 sm:$0xff]  }
 0x3de   :  { %v2592_v3 = vld [vmem:[#allocation6 + $0xa0] ss:$16 sps:$4 sm:$0xff]   ;;  %v2607_v62 = vld [vmem:[#allocation6 + $0x88] ss:$16 sps:$4 sm:$0xff]  }
 0x3df   :  { %v1002_v61 = vmul.f32 %v996_v44, %v2462_v54  ;;  %v1001_v17 = vadd.f32 0.5, %v1000_v6  ;;  %v2518_v54 = vld [vmem:[#allocation6 + $0xe8] ss:$16 sps:$4 sm:$0xff]   ;;  %v2610_v6 = vld [vmem:[#allocation6 + $0x64] ss:$16 sps:$4 sm:$0xff]  }
 0x3e0   :  { %v2595_v44 = vld [vmem:[#allocation6 + $0xa8] ss:$16 sps:$4 sm:$0xff]  }
 0x3e1   :  { %v2509_v58 = vadd.f32 %v1003_v4, %v1002_v61  ;;  %v2598_v4 = vld [vmem:[#allocation6 + $0x84] ss:$16 sps:$4 sm:$0xff]   ;;  %v2601_v61 = vld [vmem:[#allocation6 + $0x8c] ss:$16 sps:$4 sm:$0xff]  }
 0x3e3   :  { %1858 = vtanh.f32 %v2509_v58 }
 0x3f0   :  { %v1859_v18 = vpop.eup %1858 }
 0x3f1   :  { %v1006_v19 = vmul.f32 %v1859_v18, %v1001_v17  ;;  %v2616_v17 = vld [vmem:[#allocation6 + $0x60] ss:$16 sps:$4 sm:$0xff]   ;;  %v2619_v18 = vld [vmem:[#allocation6 + $0x68] ss:$16 sps:$4 sm:$0xff]  }
 0x3f3   :  { %v2513_v20 = vsel %vm1013_vm13, %v1006_v19, %v2466_v8  ;;  %v1023_v13 = vpack.c.bf16 %v1006_v19, %v1006_v19  ;;  %v2622_v19 = vld [vmem:[#allocation6 + $0x44] ss:$16 sps:$4 sm:$0xff]  }
 0x3f5   :  { %1057 = vmatmul.mubr.bf16.vlgmr.msra.gmra.mxu0 %v1023_v13  ;;  %1098 = vmatmul.mubr.bf16.vlgmr.msra.gmra.mxu1 %v1023_v13  ;;  %v2628_v13 = vld [vmem:[#allocation6 + $0x40] ss:$16 sps:$4 sm:$0xff]  }
 0x3f6   :  { %1146 = vmatpush1.bf16.msra.mxu0 %v2515_v2  ;;  %1187 = vmatpush1.bf16.msra.mxu1 %v2518_v54 }
 0x3f7   :  { %1147 = vmatprep.subr.bf16.mxu0 %v2521_v56  ;;  %1188 = vmatprep.subr.bf16.mxu1 %v2524_v0 }
 0x3f8   :  { %1177 = vmatprep.mubr.bf16.mxu0 %v2819_v1  ;;  %1218 = vmatprep.mubr.bf16.mxu1 %v2819_v1 }
 0x3fa   :  { %1148 = vmatpush1.bf16.msra.mxu0 %v2120_v21  ;;  %1189 = vmatpush1.bf16.msra.mxu1 %v2124_v22  ;;  %v2555_v21 = vld [vmem:[#allocation6 + $0xe4] ss:$16 sps:$4 sm:$0xff]   ;;  %v2558_v22 = vld [vmem:[#allocation6 + $0xec] ss:$16 sps:$4 sm:$0xff]  }
 0x3fb   :  { %1149 = vmatprep.subr.bf16.mxu0 %v2126_v23  ;;  %1190 = vmatprep.subr.bf16.mxu1 %v2130_v24  ;;  %v1251_v23 = vsel %vm1250_vm14, 1, %v2819_v1 }
 0x3fc   :  { %1253 = vperm.xlu1 %1763, %v1251_v23   ;;  %v2631_v23 = vld [vmem:[#allocation6 + $0x48] ss:$16 sps:$4 sm:$0xff]  }
 0x3fe   :  { %1150 = vmatpush1.bf16.msra.mxu0 %v2137_v26  ;;  %1191 = vmatpush1.bf16.msra.mxu1 %v2139_v27  ;;  %v2825_v27 = vld [vmem:[#allocation21_spill] sm:$0xff] }
 0x3ff   :  { %1151 = vmatprep.subr.bf16.mxu0 %v2143_v28  ;;  %1192 = vmatprep.subr.bf16.mxu1 %v2147_v29 }
 0x402   :  { %1152 = vmatpush1.bf16.msra.mxu0 %v2151_v30  ;;  %1193 = vmatpush1.bf16.msra.mxu1 %v2155_v31 }
 0x403   :  { %1153 = vmatprep.subr.bf16.mxu0 %v2159_v32  ;;  %1194 = vmatprep.subr.bf16.mxu1 %v2161_v33  ;;  %v2826_v32 = vld [vmem:[#allocation23_spill] sm:$0xff] }
 0x406   :  { %1154 = vmatpush1.bf16.msra.mxu0 %v2168_v35  ;;  %1195 = vmatpush1.bf16.msra.mxu1 %v2172_v36 }
 0x407   :  { %1155 = vmatprep.subr.bf16.mxu0 %v2174_v37  ;;  %1196 = vmatprep.subr.bf16.mxu1 %v2178_v38  ;;  %v2827_v37 = vld [vmem:[#allocation22_spill] sm:$0xff] }
 0x40a   :  { %1156 = vmatpush1.bf16.msra.mxu0 %v2184_v39  ;;  %1197 = vmatpush1.bf16.msra.mxu1 %v2186_v40 }
 0x40b   :  { %1157 = vmatprep.subr.bf16.mxu0 %v2193_v42  ;;  %1198 = vmatprep.subr.bf16.mxu1 %v2195_v43  ;;  %v2828_v43 = vld [vmem:[#allocation24_spill] sm:$0xff] }
 0x40e   :  { %1158 = vmatpush1.bf16.msra.mxu0 %v2204_v46  ;;  %1199 = vmatpush1.bf16.msra.mxu1 %v2206_v47 }
 0x40f   :  { %1159 = vmatprep.subr.bf16.mxu0 %v2210_v49  ;;  %1200 = vmatprep.subr.bf16.mxu1 %v2212_v50 }
 0x412   :  { %1160 = vmatpush1.bf16.msra.mxu0 %v2221_v52  ;;  %1201 = vmatpush1.bf16.msra.mxu1 %v2223_v53 }
 0x413   :  { %1266 = vmatprep.subr.bf16.mxu0 %v2555_v21  ;;  %1307 = vmatprep.subr.bf16.mxu1 %v2558_v22 }
 0x4b5   :  { %v1058_v24 = vpop.f32.mrf.mxu0  ;;  %v1099_v26 = vpop.f32.mrf.mxu1 }
 0x4b6   :  { %v1106_v28 = vadd.f32 %v1058_v24, %v2825_v27  ;;  %v1108_v38 = vadd.f32 %v1099_v26, %v2827_v37  ;;  %v2634_v24 = vld [vmem:[#allocation6 + $0x24] ss:$16 sps:$4 sm:$0xff]   ;;  %v2637_v26 = vld [vmem:[#allocation6 + $0x2c] ss:$16 sps:$4 sm:$0xff]   ;;  %v2640_v27 = vld [vmem:[#allocation6 + $0x20] ss:$16 sps:$4 sm:$0xff]  }
 0x4b7   :  { %v1060_v29 = vpop.f32.mrf.mxu0  ;;  %v1101_v30 = vpop.f32.mrf.mxu1  ;;  %v2829_v37 = vld [vmem:[#allocation25_spill] sm:$0xff] }
 0x4b8   :  { %v1110_v31 = vmul.f32 0.5, %v1106_v28  ;;  %v1107_v33 = vadd.f32 %v1060_v29, %v2826_v32  ;;  %v1109_v46 = vadd.f32 %v1101_v30, %v2828_v43  ;;  %v2643_v28 = vld [vmem:[#allocation6 + $0x28] ss:$16 sps:$4 sm:$0xff]   ;;  %v2646_v29 = vld [vmem:[#allocation6 + $0x4] ss:$16 sps:$4 sm:$0xff]  }
 0x4b9   :  { %v1062_v35 = vpop.f32.mrf.mxu0  ;;  %v1103_v36 = vpop.f32.mrf.mxu1  ;;  %v2649_v30 = vld [vmem:[#allocation6 + $0xc] ss:$16 sps:$4 sm:$0xff]   ;;  %v2655_v32 = vld [vmem:[#allocation6 + $0x8] ss:$16 sps:$4 sm:$0xff]   ;;  %v2830_v43 = vld [vmem:[#allocation27_spill] sm:$0xff] }
 0x4ba   :  { %1860 = vtanh.f32 %v1110_v31  ;;  %v1114_v39 = vmul.f32 0.5, %v1107_v33  ;;  %v1119_v47 = vmul.f32 0.5, %v1109_v46  ;;  %v2652_v31 = vld [vmem:[#allocation6] ss:$16 sps:$4 sm:$0xff]   ;;  %v1372_v33 = vsel %vm1371_vm0, 1, %v2819_v1 }
 0x4bb   :  { %v1063_v40 = vpop.f32.mrf.mxu0  ;;  %v1104_v42 = vpop.f32.mrf.mxu1  ;;  %1374 = vperm.xlu0 %1762, %v1372_v33  }
 0x4bc   :  { %1862 = vtanh.f32 %v1114_v39 }
 0x4bd   :  { %1864 = vtanh.f32 %v1108_v38 }
 0x4be   :  { %1866 = vtanh.f32 %v1119_v47 }
 0x4c7   :  { %v1861_v49 = vpop.eup %1860 }
 0x4c8   :  { %v1112_v50 = vmul.f32 0.5, %v1861_v49 }
 0x4c9   :  { %v1863_v52 = vpop.eup %1862 }
 0x4ca   :  { %v1113_v53 = vadd.f32 0.5, %v1112_v50  ;;  %v1116_v8 = vmul.f32 0.5, %v1863_v52  ;;  %v1865_v10 = vpop.eup %1864 }
 0x4cb   :  { %v1867_v5 = vpop.eup %1866 }
 0x4cc   :  { %v1117_v34 = vadd.f32 0.5, %v1116_v8  ;;  %v1124_v7 = vmul.f32 %v1865_v10, %v1113_v53  ;;  %v1121_v15 = vmul.f32 0.5, %v1867_v5  ;;  %v2832_v8 = vld [vmem:[#allocation28_spill] sm:$0xff] }
 0x4ce   :  { %v1123_v25 = vmul.f32 %v1117_v34, %v2509_v58  ;;  %v1122_v11 = vadd.f32 0.5, %v1121_v15  ;;  %v2604_v58 = vld [vmem:[#allocation6 + $0x80] ss:$16 sps:$4 sm:$0xff]  }
 0x4d0   :  { %v2568_v14 = vadd.f32 %v1124_v7, %v1123_v25 }
 0x4d2   :  { %1868 = vtanh.f32 %v2568_v14 }
 0x4df   :  { %v1869_v63 = vpop.eup %1868 }
 0x4e0   :  { %v1127_v48 = vmul.f32 %v1869_v63, %v1122_v11 }
 0x4e2   :  { %v2572_v41 = vsel %vm1134_vm15, %v1127_v48, %v2513_v20  ;;  %v1144_v59 = vpack.c.bf16 %v1127_v48, %v1127_v48  ;;  %v2625_v20 = vld [vmem:[#allocation6 + $0x4c] ss:$16 sps:$4 sm:$0xff]  }
 0x4e4   :  { %1178 = vmatmul.mubr.bf16.vlgmr.msra.gmra.mxu0 %v1144_v59  ;;  %1219 = vmatmul.mubr.bf16.vlgmr.msra.gmra.mxu1 %v1144_v59 }
 0x4e5   :  { %1267 = vmatpush1.bf16.msra.mxu0 %v2515_v2  ;;  %1308 = vmatpush1.bf16.msra.mxu1 %v2518_v54 }
 0x4e6   :  { %1268 = vmatprep.subr.bf16.mxu0 %v2521_v56  ;;  %1309 = vmatprep.subr.bf16.mxu1 %v2524_v0 }
 0x4e7   :  { %1298 = vmatprep.mubr.bf16.mxu0 %v2819_v1  ;;  %1339 = vmatprep.mubr.bf16.mxu1 %v2819_v1 }
 0x4e9   :  { %1269 = vmatpush1.bf16.msra.mxu0 %v2580_v9  ;;  %1310 = vmatpush1.bf16.msra.mxu1 %v2583_v57 }
 0x4ea   :  { %1270 = vmatprep.subr.bf16.mxu0 %v2586_v60  ;;  %1311 = vmatprep.subr.bf16.mxu1 %v2589_v16 }
 0x4ed   :  { %1271 = vmatpush1.bf16.msra.mxu0 %v2592_v3  ;;  %1312 = vmatpush1.bf16.msra.mxu1 %v2595_v44 }
 0x4ee   :  { %1272 = vmatprep.subr.bf16.mxu0 %v2598_v4  ;;  %1313 = vmatprep.subr.bf16.mxu1 %v2601_v61 }
 0x4f1   :  { %1273 = vmatpush1.bf16.msra.mxu0 %v2604_v58  ;;  %1314 = vmatpush1.bf16.msra.mxu1 %v2607_v62 }
 0x4f2   :  { %1274 = vmatprep.subr.bf16.mxu0 %v2610_v6  ;;  %1315 = vmatprep.subr.bf16.mxu1 %v2613_v12 }
 0x4f5   :  { %1275 = vmatpush1.bf16.msra.mxu0 %v2616_v17  ;;  %1316 = vmatpush1.bf16.msra.mxu1 %v2619_v18 }
 0x4f6   :  { %1276 = vmatprep.subr.bf16.mxu0 %v2622_v19  ;;  %1317 = vmatprep.subr.bf16.mxu1 %v2625_v20 }
 0x4f9   :  { %1277 = vmatpush1.bf16.msra.mxu0 %v2628_v13  ;;  %1318 = vmatpush1.bf16.msra.mxu1 %v2631_v23 }
 0x4fa   :  { %1278 = vmatprep.subr.bf16.mxu0 %v2634_v24  ;;  %1319 = vmatprep.subr.bf16.mxu1 %v2637_v26 }
 0x4fd   :  { %1279 = vmatpush1.bf16.msra.mxu0 %v2640_v27  ;;  %1320 = vmatpush1.bf16.msra.mxu1 %v2643_v28 }
 0x4fe   :  { %1280 = vmatprep.subr.bf16.mxu0 %v2646_v29  ;;  %1321 = vmatprep.subr.bf16.mxu1 %v2649_v30 }
 0x501   :  { %1281 = vmatpush1.bf16.msra.mxu0 %v2652_v31  ;;  %1322 = vmatpush1.bf16.msra.mxu1 %v2655_v32 }
 0x502   :  { %1387 = vmatprep.subr.bf16.mxu0 %v2555_v21  ;;  %1428 = vmatprep.subr.bf16.mxu1 %v2558_v22  ;;  %v2831_v21 = vld [vmem:[#allocation26_spill] sm:$0xff] }
 0x5a4   :  { %v1179_v35 = vpop.f32.mrf.mxu0  ;;  %v1220_v36 = vpop.f32.mrf.mxu1 }
 0x5a5   :  { %v1227_v38 = vadd.f32 %v1179_v35, %v2829_v37  ;;  %v1229_v50 = vadd.f32 %v1220_v36, %v2831_v21  ;;  %v1254_v37 = vpop.permute.xlu1 %1253 }
 0x5a6   :  { %v1181_v39 = vpop.f32.mrf.mxu0  ;;  %v1222_v40 = vpop.f32.mrf.mxu1  ;;  %vm1255_vm1 = vcmp.eq.s32.totalorder %v1254_v37, 1  ;;  %v2837_v37 = vld [vmem:[#allocation33_spill] sm:$0xff] }
 0x5a7   :  { %v1231_v42 = vmul.f32 0.5, %v1227_v38  ;;  %v1228_v46 = vadd.f32 %v1181_v39, %v2830_v43  ;;  %v1230_v10 = vadd.f32 %v1222_v40, %v2832_v8  ;;  %v1519_v8 = vld [vmem:[%s2792_s7 + $0x60] sm:$0xff] }
 0x5a8   :  { %v1183_v47 = vpop.f32.mrf.mxu0  ;;  %v1224_v49 = vpop.f32.mrf.mxu1 }
 0x5a9   :  { %1870 = vtanh.f32 %v1231_v42  ;;  %v1235_v22 = vmul.f32 0.5, %v1228_v46  ;;  %v1240_v34 = vmul.f32 0.5, %v1230_v10  ;;  %v1518_v10 = vld [vmem:[%s2792_s7 + $0x58] sm:$0xff] }
 0x5aa   :  { %v1184_v52 = vpop.f32.mrf.mxu0  ;;  %v1225_v53 = vpop.f32.mrf.mxu1 }
 0x5ab   :  { %1872 = vtanh.f32 %v1235_v22  ;;  %v1522_v22 = vld [vmem:[%s2792_s7 + $0x78] sm:$0xff]  ;;  %v1521_v52 = vld [vmem:[%s2792_s7 + $0x70] sm:$0xff]  ;;  %v1520_v53 = vld [vmem:[%s2792_s7 + $0x68] sm:$0xff] }
 0x5ac   :  { %1874 = vtanh.f32 %v1229_v50  ;;  %v2023_v50 = vmov 0.0  }
 0x5ad   :  { %1876 = vtanh.f32 %v1240_v34  ;;  %v1517_v34 = vld [vmem:[%s2792_s7 + $0x50] sm:$0xff] }
 0x5b6   :  { %v1871_v7 = vpop.eup %1870 }
 0x5b7   :  { %v1233_v25 = vmul.f32 0.5, %v1871_v7  ;;  %v1516_v7 = vld [vmem:[%s2792_s7 + $0x48] sm:$0xff] }
 0x5b8   :  { %v1873_v5 = vpop.eup %1872 }
 0x5b9   :  { %v1234_v15 = vadd.f32 0.5, %v1233_v25  ;;  %v1237_v45 = vmul.f32 0.5, %v1873_v5  ;;  %v1875_v11 = vpop.eup %1874  ;;  %v1515_v25 = vld [vmem:[%s2792_s7 + $0x40] sm:$0xff]  ;;  %v1514_v5 = vld [vmem:[%s2792_s7 + $0x38] sm:$0xff] }
 0x5ba   :  { %v1877_v35 = vpop.eup %1876 }
 0x5bb   :  { %v1238_v63 = vadd.f32 0.5, %v1237_v45  ;;  %v1245_v48 = vmul.f32 %v1875_v11, %v1234_v15  ;;  %v1242_v36 = vmul.f32 0.5, %v1877_v35  ;;  %v1513_v15 = vld [vmem:[%s2792_s7 + $0x30] sm:$0xff]  ;;  %v1512_v45 = vld [vmem:[%s2792_s7 + $0x28] sm:$0xff]  ;;  %v1511_v11 = vld [vmem:[%s2792_s7 + $0x20] sm:$0xff] }
 0x5bd   :  { %v1244_v59 = vmul.f32 %v1238_v63, %v2568_v14  ;;  %v1243_v38 = vadd.f32 0.5, %v1242_v36  ;;  %v1510_v63 = vld [vmem:[%s2792_s7 + $0x18] sm:$0xff] }
 0x5bf   :  { %v2667_v33 = vadd.f32 %v1245_v48, %v1244_v59  ;;  %v1509_v48 = vld [vmem:[%s2792_s7 + $0x10] sm:$0xff]  ;;  %v1508_v59 = vld [vmem:[%s2792_s7 + $0x8] sm:$0xff] }
 0x5c1   :  { %1878 = vtanh.f32 %v2667_v33 }
 0x5ce   :  { %v1879_v39 = vpop.eup %1878 }
 0x5cf   :  { %v1248_v40 = vmul.f32 %v1879_v39, %v1243_v38 }
 0x5d1   :  { %v2671_v42 = vsel %vm1255_vm1, %v1248_v40, %v2572_v41  ;;  %v1265_v43 = vpack.c.bf16 %v1248_v40, %v1248_v40 }
 0x5d3   :  { %1299 = vmatmul.mubr.bf16.vlgmr.msra.gmra.mxu0 %v1265_v43  ;;  %1340 = vmatmul.mubr.bf16.vlgmr.msra.gmra.mxu1 %v1265_v43 }
 0x5d4   :  { %1388 = vmatpush1.bf16.msra.mxu0 %v2515_v2  ;;  %1429 = vmatpush1.bf16.msra.mxu1 %v2518_v54  ;;  %v1493_v2 = vsel %vm1492_vm3, 1, %v2819_v1 }
 0x5d5   :  { %1389 = vmatprep.subr.bf16.mxu0 %v2521_v56  ;;  %1430 = vmatprep.subr.bf16.mxu1 %v2524_v0  ;;  %v2833_v0 = vld [vmem:[#allocation29_spill] sm:$0xff] }
 0x5d6   :  { %1419 = vmatprep.mubr.bf16.mxu0 %v2819_v1  ;;  %1460 = vmatprep.mubr.bf16.mxu1 %v2819_v1  ;;  %v2836_v1 = vld [vmem:[#allocation32_spill] sm:$0xff] }
 0x5d7   :  { %1495 = vperm.xlu1 %1763, %v1493_v2  }
 0x5d8   :  { %1390 = vmatpush1.bf16.msra.mxu0 %v2580_v9  ;;  %1431 = vmatpush1.bf16.msra.mxu1 %v2583_v57 }
 0x5d9   :  { %1391 = vmatprep.subr.bf16.mxu0 %v2586_v60  ;;  %1432 = vmatprep.subr.bf16.mxu1 %v2589_v16  ;;  %v2834_v60 = vld [vmem:[#allocation31_spill] sm:$0xff] }
 0x5dc   :  { %1392 = vmatpush1.bf16.msra.mxu0 %v2592_v3  ;;  %1433 = vmatpush1.bf16.msra.mxu1 %v2595_v44 }
 0x5dd   :  { %1393 = vmatprep.subr.bf16.mxu0 %v2598_v4  ;;  %1434 = vmatprep.subr.bf16.mxu1 %v2601_v61  ;;  %v2835_v4 = vld [vmem:[#allocation30_spill] sm:$0xff] }
 0x5e0   :  { %1394 = vmatpush1.bf16.msra.mxu0 %v2604_v58  ;;  %1435 = vmatpush1.bf16.msra.mxu1 %v2607_v62 }
 0x5e1   :  { %1395 = vmatprep.subr.bf16.mxu0 %v2610_v6  ;;  %1436 = vmatprep.subr.bf16.mxu1 %v2613_v12 }
 0x5e4   :  { %1396 = vmatpush1.bf16.msra.mxu0 %v2616_v17  ;;  %1437 = vmatpush1.bf16.msra.mxu1 %v2619_v18 }
 0x5e5   :  { %1397 = vmatprep.subr.bf16.mxu0 %v2622_v19  ;;  %1438 = vmatprep.subr.bf16.mxu1 %v2625_v20 }
 0x5e8   :  { %1398 = vmatpush1.bf16.msra.mxu0 %v2628_v13  ;;  %1439 = vmatpush1.bf16.msra.mxu1 %v2631_v23 }
 0x5e9   :  { %1399 = vmatprep.subr.bf16.mxu0 %v2634_v24  ;;  %1440 = vmatprep.subr.bf16.mxu1 %v2637_v26 }
 0x5ec   :  { %1400 = vmatpush1.bf16.msra.mxu0 %v2640_v27  ;;  %1441 = vmatpush1.bf16.msra.mxu1 %v2643_v28 }
 0x5ed   :  { %1401 = vmatprep.subr.bf16.mxu0 %v2646_v29  ;;  %1442 = vmatprep.subr.bf16.mxu1 %v2649_v30 }
 0x5f0   :  { %1402 = vmatpush1.bf16.msra.mxu0 %v2652_v31  ;;  %1443 = vmatpush1.bf16.msra.mxu1 %v2655_v32  ;;  %v1375_v31 = vpop.permute.xlu0 %1374 }
 0x5f1   :  { %vm1376_vm4 = vcmp.eq.s32.totalorder %v1375_v31, 1  ;;  %1717 = vmatprep.subr.mxu0 %v2023_v50 }
 0x693   :  { %v1300_v54 = vpop.f32.mrf.mxu0  ;;  %v1341_v56 = vpop.f32.mrf.mxu1 }
 0x694   :  { %v1348_v14 = vadd.f32 %v1300_v54, %v2833_v0  ;;  %v1350_v61 = vadd.f32 %v1341_v56, %v2835_v4  ;;  %v2838_v56 = vld [vmem:[#allocation34_spill] sm:$0xff] }
 0x695   :  { %v1302_v41 = vpop.f32.mrf.mxu0  ;;  %v1343_v9 = vpop.f32.mrf.mxu1 }
 0x696   :  { %v1352_v57 = vmul.f32 0.5, %v1348_v14  ;;  %v1349_v16 = vadd.f32 %v1302_v41, %v2834_v60  ;;  %v1351_v6 = vadd.f32 %v1343_v9, %v2836_v1 }
 0x697   :  { %v1304_v3 = vpop.f32.mrf.mxu0  ;;  %v1345_v44 = vpop.f32.mrf.mxu1 }
 0x698   :  { %1880 = vtanh.f32 %v1352_v57  ;;  %v1356_v58 = vmul.f32 0.5, %v1349_v16  ;;  %v1361_v12 = vmul.f32 0.5, %v1351_v6  ;;  %v2839_v57 = vld [vmem:[#allocation35_spill] sm:$0xff] }
 0x699   :  { %v1305_v62 = vpop.f32.mrf.mxu0  ;;  %v1346_v51 = vpop.f32.mrf.mxu1 }
 0x69a   :  { %1882 = vtanh.f32 %v1356_v58 }
 0x69b   :  { %1884 = vtanh.f32 %v1350_v61 }
 0x69c   :  { %1886 = vtanh.f32 %v1361_v12 }
 0x6a5   :  { %v1881_v17 = vpop.eup %1880 }
 0x6a6   :  { %v1354_v18 = vmul.f32 0.5, %v1881_v17 }
 0x6a7   :  { %v1883_v19 = vpop.eup %1882 }
 0x6a8   :  { %v1355_v20 = vadd.f32 0.5, %v1354_v18  ;;  %v1358_v13 = vmul.f32 0.5, %v1883_v19  ;;  %v1885_v23 = vpop.eup %1884  ;;  %v1496_v19 = vpop.permute.xlu1 %1495 }
 0x6a9   :  { %v1887_v29 = vpop.eup %1886  ;;  %vm1497_vm6 = vcmp.eq.s32.totalorder %v1496_v19, 1 }
 0x6aa   :  { %v1359_v24 = vadd.f32 0.5, %v1358_v13  ;;  %v1366_v26 = vmul.f32 %v1885_v23, %v1355_v20  ;;  %v1363_v30 = vmul.f32 0.5, %v1887_v29 }
 0x6ac   :  { %v1365_v27 = vmul.f32 %v1359_v24, %v2667_v33  ;;  %v1364_v32 = vadd.f32 0.5, %v1363_v30  ;;  %v1507_v33 = vld [vmem:[%s2792_s7] sm:$0xff]  ;;  %s2025_s7 = smov [#allocation10]  }
 0x6ad   :  { %s1617_s24 = sshll.u32 %s2025_s7, 4  ;;  %s1618_s24 = int_to_ptr.vmem [resolvable:$true] %s1617_s24 }
 0x6ae   :  { %v2712_v28 = vadd.f32 %v1366_v26, %v1365_v27  ;;  %s1952_s25 = scalar_lea.vmem %s1618_s24, 128  ;;  %p1957_p6 = scmp.lt.s32.totalorder %s1618_s24, %s1618_s24 }
 0x6af   :  { %p1953_p5 = scmp.ne.s32.totalorder %s1618_s24, %s1952_s25  ;;  %p1958_p7 = scmp.lt.s32.totalorder %s1952_s25, %s1952_s25 }
 0x6b0   :  { %1888 = vtanh.f32 %v2712_v28 }
 0x6b1   :  { %p1959_p8 = por %p1958_p7, %p1957_p6 }
 0x6b3   :  { %p1960_p9 = pnand %p1959_p8, %p1953_p5 }
 0x6bd   :  { %v1889_v46 = vpop.eup %1888 }
 0x6be   :  { %v1369_v47 = vmul.f32 %v1889_v46, %v1364_v32 }
 0x6c0   :  { %v2716_v49 = vsel %vm1376_vm4, %v1369_v47, %v2671_v42  ;;  %v1386_v21 = vpack.c.bf16 %v1369_v47, %v1369_v47 }
 0x6c2   :  { %1420 = vmatmul.mubr.bf16.vlgmr.msra.gmra.mxu0 %v1386_v21  ;;  %1461 = vmatmul.mubr.bf16.vlgmr.msra.gmra.mxu1 %v1386_v21 }
 0x6c3   :  { %1718 = vmatpush3.msra.mxu0 %v1522_v22  ;;  %1749 = vmatprep.mubr.msk.f32.mxu0 %vm2024_vm5, %v2023_v50 }
 0x6c4   :  { %1719 = vmatprep.subr.mxu0 %v2023_v50 }
 0x6c5   :  { %1720 = vmatpush3.msra.mxu0 %v1521_v52 }
 0x6c6   :  { %1721 = vmatprep.subr.mxu0 %v2023_v50 }
 0x6c7   :  { %1722 = vmatpush3.msra.mxu0 %v1520_v53 }
 0x6c8   :  { %1723 = vmatprep.subr.mxu0 %v2023_v50 }
 0x6c9   :  { %1724 = vmatpush3.msra.mxu0 %v1519_v8 }
 0x6ca   :  { %1725 = vmatprep.subr.mxu0 %v2023_v50 }
 0x6cb   :  { %1726 = vmatpush3.msra.mxu0 %v1518_v10 }
 0x6cc   :  { %1727 = vmatprep.subr.mxu0 %v2023_v50 }
 0x6cd   :  { %1728 = vmatpush3.msra.mxu0 %v1517_v34 }
 0x6ce   :  { %1729 = vmatprep.subr.mxu0 %v2023_v50 }
 0x6cf   :  { %1730 = vmatpush3.msra.mxu0 %v1516_v7 }
 0x6d0   :  { %1731 = vmatprep.subr.mxu0 %v2023_v50 }
 0x6d1   :  { %1732 = vmatpush3.msra.mxu0 %v1515_v25 }
 0x6d2   :  { %1733 = vmatprep.subr.mxu0 %v2023_v50 }
 0x6d3   :  { %1734 = vmatpush3.msra.mxu0 %v1514_v5 }
 0x6d4   :  { %1735 = vmatprep.subr.mxu0 %v2023_v50 }
 0x6d5   :  { %1736 = vmatpush3.msra.mxu0 %v1513_v15 }
 0x6d6   :  { %1737 = vmatprep.subr.mxu0 %v2023_v50 }
 0x6d7   :  { %1738 = vmatpush3.msra.mxu0 %v1512_v45 }
 0x6d8   :  { %1739 = vmatprep.subr.mxu0 %v2023_v50 }
 0x6d9   :  { %1740 = vmatpush3.msra.mxu0 %v1511_v11 }
 0x6da   :  { %1741 = vmatprep.subr.mxu0 %v2023_v50 }
 0x6db   :  { %1742 = vmatpush3.msra.mxu0 %v1510_v63 }
 0x6dc   :  { %1743 = vmatprep.subr.mxu0 %v2023_v50 }
 0x6dd   :  { %1744 = vmatpush3.msra.mxu0 %v1509_v48 }
 0x6de   :  { %1745 = vmatprep.subr.mxu0 %v2023_v50 }
 0x6df   :  { %1746 = vmatpush3.msra.mxu0 %v1508_v59 }
 0x6e0   :  { %1747 = vmatprep.subr.mxu0 %v2023_v50 }
 0x6e1   :  { %1748 = vmatpush3.msra.mxu0 %v1507_v33 }
 0x782   :  { %v1421_v35 = vpop.f32.mrf.mxu0  ;;  %v1462_v36 = vpop.f32.mrf.mxu1 }
 0x783   :  { %v1469_v38 = vadd.f32 %v1421_v35, %v2837_v37  ;;  %v1471_v0 = vadd.f32 %v1462_v36, %v2838_v56 }
 0x784   :  { %v1423_v39 = vpop.f32.mrf.mxu0  ;;  %v1464_v40 = vpop.f32.mrf.mxu1 }
 0x785   :  { %v1473_v42 = vmul.f32 0.5, %v1469_v38  ;;  %v1470_v43 = vadd.f32 %v1423_v39, %v2354_v55  ;;  %v1472_v60 = vadd.f32 %v1464_v40, %v2839_v57 }
 0x786   :  { %v1425_v2 = vpop.f32.mrf.mxu0  ;;  %v1466_v54 = vpop.f32.mrf.mxu1 }
 0x787   :  { %1890 = vtanh.f32 %v1473_v42  ;;  %v1477_v14 = vmul.f32 0.5, %v1470_v43  ;;  %v1482_v16 = vmul.f32 0.5, %v1472_v60 }
 0x788   :  { %v1426_v41 = vpop.f32.mrf.mxu0  ;;  %v1467_v9 = vpop.f32.mrf.mxu1 }
 0x789   :  { %1892 = vtanh.f32 %v1477_v14 }
 0x78a   :  { %1894 = vtanh.f32 %v1471_v0 }
 0x78b   :  { %1896 = vtanh.f32 %v1482_v16 }
 0x794   :  { %v1891_v3 = vpop.eup %1890 }
 0x795   :  { %v1475_v44 = vmul.f32 0.5, %v1891_v3 }
 0x796   :  { %v1893_v4 = vpop.eup %1892 }
 0x797   :  { %v1476_v61 = vadd.f32 0.5, %v1475_v44  ;;  %v1479_v58 = vmul.f32 0.5, %v1893_v4  ;;  %v1895_v55 = vpop.eup %1894 }
 0x798   :  { %v1897_v12 = vpop.eup %1896 }
 0x799   :  { %v1480_v62 = vadd.f32 0.5, %v1479_v58  ;;  %v1487_v51 = vmul.f32 %v1895_v55, %v1476_v61  ;;  %v1484_v17 = vmul.f32 0.5, %v1897_v12 }
 0x79b   :  { %v1486_v1 = vmul.f32 %v1480_v62, %v2712_v28  ;;  %v1485_v18 = vadd.f32 0.5, %v1484_v17 }
 0x79d   :  { %v1488_v6 = vadd.f32 %v1487_v51, %v1486_v1 }
 0x79f   :  { %1898 = vtanh.f32 %v1488_v6  ;;  %1506 = vst [vmem:[#allocation12] sm:$0xff] %v1488_v6 }
 0x7ac   :  { %v1899_v20 = vpop.eup %1898 }
 0x7ad   :  { %v1490_v13 = vmul.f32 %v1899_v20, %v1485_v18 }
 0x7af   :  { %v1498_v23 = vsel %vm1497_vm6, %v1490_v13, %v2716_v49  ;;  %1505 = vst [vmem:[#allocation10] sm:$0xff] %v1490_v13 }
 0x7b0   :  { %1750 = vmatmul.mubr.f32.vlgmr.msra.gmra.mxu0 %v1498_v23 }
 0x7b1   :  { %1963 = shalt.err (!%p1960_p9)
}
 0x7b2   :  { %1620 = dma.vmem_to_hbm [thread:$0]  %s1618_s24, 128, %s2795_s10, [#allocation11]  }
 0x7b3   :  { %s2026_s27 = smov [#allocation12]  }
 0x7b4   :  { %s1627_s28 = sshll.u32 %s2026_s27, 4  ;;  %s1628_s28 = int_to_ptr.vmem [resolvable:$true] %s1627_s28 }
 0x7b5   :  { %s1972_s4 = scalar_lea.vmem %s1628_s28, 128  ;;  %p1977_p11 = scmp.lt.s32.totalorder %s1628_s28, %s1628_s28 }
 0x7b6   :  { %p1973_p10 = scmp.ne.s32.totalorder %s1628_s28, %s1972_s4  ;;  %p1978_p12 = scmp.lt.s32.totalorder %s1972_s4, %s1972_s4 }
 0x7b8   :  { %p1979_p13 = por %p1978_p12, %p1977_p11 }
 0x7ba   :  { %p1980_p0 = pnand %p1979_p13, %p1973_p10 }
 0x7bc   :  { %1983 = shalt.err (!%p1980_p0)
}
 0x7bd   :  { %1630 = dma.vmem_to_hbm [thread:$0]  %s1628_s28, 128, %s2796_s11, [#allocation11]   ;;  %v1699_v24 = vld [vmem:[%s2793_s8] ss:$0 sm:$0xff] }
 0x7be   :  { %s2027_s14 = smov [#allocation9]  }
 0x7bf   :  { %s1607_s10 = sshll.u32 %s2027_s14, 4  ;;  %s1608_s10 = int_to_ptr.vmem [resolvable:$true] %s1607_s10 }
 0x7c0   :  { %s1992_s15 = scalar_lea.vmem %s1608_s10, 128  ;;  %p1997_p2 = scmp.lt.s32.totalorder %s1608_s10, %s1608_s10 }
 0x7c1   :  { %p1993_p1 = scmp.ne.s32.totalorder %s1608_s10, %s1992_s15  ;;  %p1998_p3 = scmp.lt.s32.totalorder %s1992_s15, %s1992_s15 }
 0x7c3   :  { %p1999_p4 = por %p1998_p3, %p1997_p2 }
 0x7c5   :  { %p2000_p5 = pnand %p1999_p4, %p1993_p1 }
 0x870   :  { %v1596_v26 = vpop.f32.mrf.mxu0 }
 0x871   :  { %v1597_v27 = vadd.f32 %v1699_v24, %v1596_v26 }
 0x872   :  { %v1751_v28 = vpop.f32.mrf.mxu0 }
 0x873   :  { %1600 = vst.msk [vmem:[#allocation9] sm:$0xff] %vm123_vm2, %v1597_v27 }
 0x874   :  { %2003 = shalt.err (!%p2000_p5)
}
 0x875   :  { %1610 = dma.vmem_to_hbm [thread:$0]  %s1608_s10, 128, %s2794_s9, [#allocation8]  }
 0x876   :  { %2014 = dma.done.wait [#allocation8], 128  }
 0x877   :  { %2015 = vsyncadd [#allocation8], 4294967168 }
 0x878   :  { %2016 = dma.done.wait [#allocation11], 256  }
 0x879   :  { %2017 = vsyncadd [#allocation11], 4294967040 }
 0x87a   :  { %1640 = vsyncpa [#allocation7], 1 }
 0x87b   :  { %1641 = vsyncpa [#allocation8], 1 }
 0x87c   :  { %1642 = vsyncpa [#allocation11], 1 }

</bundles_post_ra>
